<compile_context>
chip_gen: v7x
topology: tpu7x:2x2x1
jax: 0.10.0
libtpu: 0.0.40
codegen_flags: <defaults>
</compile_context>

<pallas_src>
import functools

import jax
import jax.numpy as jnp
from jax.experimental import pallas as pl
from jax.experimental.pallas import tpu as pltpu


# ----------------------------------------------------------------------------
# Fused Pallas kernel: one BiQRNNConv3D layer for one pixel tile
# ----------------------------------------------------------------------------
def _fused_layer_kernel(pt_ref, w_ref, o_ref, zf_ref, *, hidden, seq, ptile):
    """pt_ref: (Kp, D*P) bf16 im2col patches, lane index = d*P + pixel
       w_ref : (3C, Kp)  bf16 conv weights for the Z|F1|F2 gates
       o_ref : (D, C, P) f32  bidirectional QRNN output (hl + hr)
       zf_ref: (3C, D*P) f32  VMEM scratch: tanh(Z) | sigmoid(F1) | sigmoid(F2)."""
    C, D, P = hidden, seq, ptile

    # (1) ONE MXU dot covers every gate, time step and pixel of this tile.
    g = jnp.dot(w_ref[...], pt_ref[...],
                preferred_element_type=jnp.float32)          # (3C, D*P) f32

    # (2) One vectorized tanh pass (Z rows) + one sigmoid pass (F1|F2 rows),
    #     stored to a single dense scratch slab (no per-step transcendentals).
    #     TODO(synk): zf scratch could be bf16 on v7x for extra VMEM headroom.
    zf_ref[:C, :] = jnp.tanh(g[:C, :])
    zf_ref[C:, :] = jax.nn.sigmoid(g[C:, :])

    # (3) Forward recurrence; hidden state written straight into the output
    #     block (no hl scratch).  D is small & static -> unrolled; every lane
    #     slice starts at a multiple of P (>= 128), so accesses stay aligned.
    h = jnp.zeros((C, P), jnp.float32)
    for d in range(D):
        z = zf_ref[:C, d * P:(d + 1) * P]
        f1 = zf_ref[C:2 * C, d * P:(d + 1) * P]
        h = f1 * h + (1.0 - f1) * z
        o_ref[d] = h

    # (4) Reversed recurrence fused with the hl + hr add (read-modify-write on
    #     the VMEM-resident output block).
    h = jnp.zeros((C, P), jnp.float32)
    for i in range(D):
        d = D - 1 - i
        z = zf_ref[:C, d * P:(d + 1) * P]
        f2 = zf_ref[2 * C:, d * P:(d + 1) * P]
        h = f2 * h + (1.0 - f2) * z
        o_ref[d] = o_ref[d] + h


def _pick_pixel_tile(q):
    """Largest lane-dense pixel tile giving >= 2 grid steps (sweep for big HW)."""
    for cand in (512, 256, 128):
        if q % cand == 0 and q // cand >= 2:
            return cand
    return q


# ----------------------------------------------------------------------------
# One BiQRNNConv3D layer (JAX glue: BN fold + im2col; Pallas: everything else)
# ----------------------------------------------------------------------------
def biqrnn_conv3d_layer(x, params, stride):
    """x: (N, D, H, W, Cin) float32 -> (N, D', H', W', hidden) float32."""
    N, D, H, W, Cin = x.shape
    sd, sh, sw = stride
    C3 = params["conv_w"].shape[0]
    C = C3 // 3

    # (1) BatchNorm3d eval-mode affine folded into the im2col glue (XLA fuses
    #     it with the pad/gather; no extra HBM round trip).
    a = params["bn_gamma"] / jnp.sqrt(params["bn_var"] + 1e-5)
    b = params["bn_beta"] - params["bn_mean"] * a
    xb = x * a + b

    Do = (D + 2 - 3) // sd + 1
    Ho = (H + 2 - 3) // sh + 1
    Wo = (W + 2 - 3) // sw + 1
    HW = Ho * Wo
    Q = N * HW                        # batch folded into the pixel/lane axis
    PT = _pick_pixel_tile(Q)
    n_t = Q // PT
    K = 27 * Cin
    Kp = ((K + 15) // 16) * 16        # pad only to the bf16 sublane tile (112)

    # (2) im2col in (tile, Kp, D*P) layout (lane index = d*PT + pixel), bf16.
    xp = jnp.pad(xb, ((0, 0), (1, 1), (1, 1), (1, 1), (0, 0)))
    cols = []
    for kd in range(3):
        for kh in range(3):
            for kw in range(3):
                cols.append(
                    xp[:,
                       kd:kd + (Do - 1) * sd + 1:sd,
                       kh:kh + (Ho - 1) * sh + 1:sh,
                       kw:kw + (Wo - 1) * sw + 1:sw, :])
    pat = jnp.stack(cols, axis=-2).reshape(N, Do, HW, K)      # (N,Do,HW,K)
    patT = jnp.transpose(pat, (3, 1, 0, 2)).reshape(K, Do, Q)  # (K,Do,Q)
    patT = jnp.pad(patT, ((0, Kp - K), (0, 0), (0, 0)))
    patT = patT.reshape(Kp, Do, n_t, PT).transpose(2, 0, 1, 3)
    patT = patT.reshape(n_t, Kp, Do * PT).astype(jnp.bfloat16)

    # torch Conv3d weight (3C, Cin, kd,kh,kw) -> (3C, kd,kh,kw,Cin) -> (3C, Kp)
    w = jnp.transpose(params["conv_w"], (0, 2, 3, 4, 1)).reshape(C3, K)
    w = jnp.pad(w, ((0, 0), (0, Kp - K))).astype(jnp.bfloat16)

    kern = functools.partial(_fused_layer_kernel, hidden=C, seq=Do, ptile=PT)
    out = pl.pallas_call(
        kern,
        grid=(n_t,),
        in_specs=[
            pl.BlockSpec((None, Kp, Do * PT), lambda t: (t, 0, 0)),
            pl.BlockSpec((C3, Kp), lambda t: (0, 0)),
        ],
        out_specs=pl.BlockSpec((None, Do, C, PT), lambda t: (t, 0, 0, 0)),
        out_shape=jax.ShapeDtypeStruct((n_t, Do, C, PT), jnp.float32),
        scratch_shapes=[
            pltpu.VMEM((C3, Do * PT), jnp.float32),   # tanh(Z) | sig(F1) | sig(F2)
        ],
        compiler_params=pltpu.CompilerParams(
            dimension_semantics=("parallel",)),        # tiles shard across TCs
        cost_estimate=pl.CostEstimate(
            flops=2 * C3 * Kp * Do * Q + 8 * C * Do * Q,
            transcendentals=3 * C * Do * Q,
            bytes_accessed=patT.size * 2 + w.size * 2 + Do * C * Q * 4),
    )(patT, w)

    # back to NDHWC (XLA fuses this relayout with the next layer's im2col).
    out = jnp.transpose(out, (1, 2, 0, 3)).reshape(Do, C, N, Ho, Wo)
    return jnp.transpose(out, (2, 0, 3, 4, 1))


def biqrnn3d_encoder(x, layer_params, strides, xs):
    num_half_layer = len(layer_params)
    for i in range(num_half_layer - 1):
        x = biqrnn_conv3d_layer(x, layer_params[i], strides[i])
        xs.append(x)
    x = biqrnn_conv3d_layer(x, layer_params[-1], strides[-1])
    return x


@functools.partial(jax.jit, static_argnums=(2,))
def _encoder_jit(x, layer_params, strides):
    xs = []
    out = biqrnn3d_encoder(x, layer_params, strides, xs)
    return out, tuple(xs)


# ----------------------------------------------------------------------------
# Deterministic parameter initialization (synthetic, no checkpoint)
# ----------------------------------------------------------------------------
def init_params(key, channels, num_half_layer, sample_idx):
    params, strides = [], []
    ch = channels
    for i in range(num_half_layer):
        if i in sample_idx:
            hidden, stride = 2 * ch, (1, 2, 2)
        else:
            hidden, stride = ch, (1, 1, 1)
        k = jax.random.fold_in(key, i)
        kw_, kg, kb, km, kv = jax.random.split(k, 5)
        wstd = 1.0 / float(ch * 27) ** 0.5
        params.append(dict(
            conv_w=jax.random.uniform(kw_, (3 * hidden, ch, 3, 3, 3),
                                      jnp.float32, -wstd, wstd),
            bn_gamma=1.0 + 0.1 * jax.random.normal(kg, (ch,), jnp.float32),
            bn_beta=0.1 * jax.random.normal(kb, (ch,), jnp.float32),
            bn_mean=0.1 * jax.random.normal(km, (ch,), jnp.float32),
            bn_var=1.0 + 0.1 * jax.random.uniform(kv, (ch,), jnp.float32),
        ))
        strides.append(stride)
        ch = hidden
    return params, tuple(strides)


# ----------------------------------------------------------------------------
# Pure-JAX reference (for correctness check)
# ----------------------------------------------------------------------------
def _ref_layer(x, p, stride, use_bf16):
    a = p["bn_gamma"] / jnp.sqrt(p["bn_var"] + 1e-5)
    b = p["bn_beta"] - p["bn_mean"] * a
    xb = x * a + b
    w = jnp.transpose(p["conv_w"], (2, 3, 4, 1, 0))  # (kd,kh,kw,Cin,3C)
    if use_bf16:   # mirror the kernel's bf16 MXU operands (f32 accumulation)
        xb = xb.astype(jnp.bfloat16)
        w = w.astype(jnp.bfloat16)
    g = jax.lax.conv_general_dilated(
        xb, w, window_strides=stride, padding=[(1, 1)] * 3,
        dimension_numbers=("NDHWC", "DHWIO", "NDHWC"),
        preferred_element_type=jnp.float32)
    C = p["conv_w"].shape[0] // 3
    Z = jnp.tanh(g[..., :C])
    F1 = jax.nn.sigmoid(g[..., C:2 * C])
    F2 = jax.nn.sigmoid(g[..., 2 * C:])

    def step(h, zf):
        z, f = zf
        h = f * h + (1 - f) * z
        return h, h

    Zt, F1t, F2t = (jnp.moveaxis(t, 1, 0) for t in (Z, F1, F2))
    h0 = jnp.zeros_like(Zt[0])
    _, hl = jax.lax.scan(step, h0, (Zt, F1t))
    _, hr = jax.lax.scan(step, h0, (Zt[::-1], F2t[::-1]))
    return jnp.moveaxis(hl, 0, 1) + jnp.moveaxis(hr[::-1], 0, 1)


# ----------------------------------------------------------------------------
if __name__ == "__main__":
    key = jax.random.PRNGKey(0)
    N, C0, D, H, W = 2, 4, 8, 16, 16          # torch input: (2, 4, 8, 16, 16) NCDHW
    num_half_layer = 2
    sample_idx = (1,)                          # second layer downsamples H,W, doubles C

    params, strides = init_params(jax.random.fold_in(key, 1), C0,
                                  num_half_layer, sample_idx)
    x = jax.random.normal(jax.random.fold_in(key, 2), (N, D, H, W, C0),
                          jnp.float32)

    out, xs = _encoder_jit(x, params, strides)
    out = jax.block_until_ready(out)

    # Shape checks (first layer keeps shape, last layer downsamples & doubles C).
    assert xs[0].shape == (N, D, H, W, C0)
    assert out.shape == (N, D, H // 2, W // 2, 2 * C0)

    # Tight check vs. a reference that uses the same bf16 conv operands.
    ref16 = x
    ref32 = x
    for p, s in zip(params, strides):
        ref16 = _ref_layer(ref16, p, s, True)
        ref32 = _ref_layer(ref32, p, s, False)
    err16 = float(jnp.max(jnp.abs(out - ref16)))
    assert err16 < 3e-3, f"max abs err vs bf16-matmul reference too large: {err16}"

    # Loose sanity bound vs. the full-f32 reference (bf16 quantization only).
    err32 = float(jnp.max(jnp.abs(out - ref32)))
    assert err32 < 1.5e-1, f"max abs err vs f32 reference too large: {err32}"

    print("KERNEL_OK")
</pallas_src>

<mosaic_0001>
module attributes {stable_mosaic.version = 11 : i64} {
  func.func @_fused_layer_kernel(%arg0: i32, %arg1: memref<1x112x2048xbf16, #tpu.memory_space<vmem>>, %arg2: memref<12x112xbf16, #tpu.memory_space<vmem>>, %arg3: memref<1x8x4x256xf32, #tpu.memory_space<vmem>>, %arg4: memref<12x2048xf32, #tpu.memory_space<vmem>>) attributes {dimension_semantics = [#tpu.dimension_semantics<parallel>], iteration_bounds = array<i64: 2>, scalar_prefetch = 0 : i64, scratch_operands = 1 : i64, tpu.core_type = #tpu.core_type<tc>, window_params = [{transform_indices = @transform_0, window_bounds = array<i64: 1, 112, 2048>}, {pipeline_mode = #tpu.pipeline_mode<synchronous>, transform_indices = @transform_1, window_bounds = array<i64: 12, 112>}, {transform_indices = @transform_2, window_bounds = array<i64: 1, 8, 4, 256>}]} {
    %c0 = arith.constant 0 : index
    %c0_0 = arith.constant 0 : index
    %0 = vector.load %arg2[%c0, %c0_0] : memref<12x112xbf16, #tpu.memory_space<vmem>>, vector<12x112xbf16>
    %c0_1 = arith.constant 0 : index
    %c0_2 = arith.constant 0 : index
    %c0_3 = arith.constant 0 : index
    %1 = vector.load %arg1[%c0_1, %c0_2, %c0_3] : memref<1x112x2048xbf16, #tpu.memory_space<vmem>>, vector<1x112x2048xbf16>
    %2 = vector.shape_cast %1 : vector<1x112x2048xbf16> to vector<112x2048xbf16>
    %cst = arith.constant dense<0.000000e+00> : vector<12x2048xf32>
    %3 = tpu.matmul %0, %2, %cst {dimension_numbers = #tpu.dot_dimension_numbers<[1], [0], [0], [1], [0, 0, 1, 1], [], []>} : vector<12x112xbf16>, vector<112x2048xbf16>, vector<12x2048xf32> -> vector<12x2048xf32>
    %4 = vector.extract_strided_slice %3 {offsets = [0, 0], sizes = [4, 2048], strides = [1, 1]} : vector<12x2048xf32> to vector<4x2048xf32>
    %5 = math.tanh %4 : vector<4x2048xf32>
    %c0_4 = arith.constant 0 : index
    %c0_5 = arith.constant 0 : index
    %6 = vector.load %arg4[%c0_4, %c0_5] : memref<12x2048xf32, #tpu.memory_space<vmem>>, vector<4x2048xf32>
    tpu.vector_store %arg4[%c0_4, %c0_5], %5 {strides = array<i32>} : memref<12x2048xf32, #tpu.memory_space<vmem>>, vector<4x2048xf32>,
    %7 = vector.extract_strided_slice %3 {offsets = [4, 0], sizes = [8, 2048], strides = [1, 1]} : vector<12x2048xf32> to vector<8x2048xf32>
    %8 = arith.negf %7 : vector<8x2048xf32>
    %9 = math.exp %8 : vector<8x2048xf32>
    %cst_6 = arith.constant 1.000000e+00 : f32
    %10 = vector.broadcast %cst_6 : f32 to vector<8x2048xf32>
    %11 = arith.addf %10, %9 : vector<8x2048xf32>
    %12 = arith.divf %10, %11 : vector<8x2048xf32>
    %c4 = arith.constant 4 : index
    %c0_7 = arith.constant 0 : index
    %13 = vector.load %arg4[%c4, %c0_7] : memref<12x2048xf32, #tpu.memory_space<vmem>>, vector<8x2048xf32>
    tpu.vector_store %arg4[%c4, %c0_7], %12 {strides = array<i32>} : memref<12x2048xf32, #tpu.memory_space<vmem>>, vector<8x2048xf32>,
    %cst_8 = arith.constant 0.000000e+00 : f32
    %14 = vector.broadcast %cst_8 : f32 to vector<4x256xf32>
    %c0_9 = arith.constant 0 : index
    %c0_10 = arith.constant 0 : index
    %15 = vector.load %arg4[%c0_9, %c0_10] : memref<12x2048xf32, #tpu.memory_space<vmem>>, vector<4x256xf32>
    %c4_11 = arith.constant 4 : index
    %c0_12 = arith.constant 0 : index
    %16 = vector.load %arg4[%c4_11, %c0_12] : memref<12x2048xf32, #tpu.memory_space<vmem>>, vector<4x256xf32>
    %17 = arith.mulf %16, %14 : vector<4x256xf32>
    %cst_13 = arith.constant 1.000000e+00 : f32
    %18 = vector.broadcast %cst_13 : f32 to vector<4x256xf32>
    %19 = arith.subf %18, %16 : vector<4x256xf32>
    %20 = arith.mulf %19, %15 : vector<4x256xf32>
    %21 = arith.addf %17, %20 : vector<4x256xf32>
    %c0_14 = arith.constant 0 : index
    %c0_15 = arith.constant 0 : index
    %c0_16 = arith.constant 0 : index
    %c0_17 = arith.constant 0 : index
    %22 = vector.load %arg3[%c0_14, %c0_15, %c0_16, %c0_17] : memref<1x8x4x256xf32, #tpu.memory_space<vmem>>, vector<1x1x4x256xf32>
    %23 = vector.shape_cast %22 : vector<1x1x4x256xf32> to vector<4x256xf32>
    %24 = vector.shape_cast %21 : vector<4x256xf32> to vector<1x1x4x256xf32>
    tpu.vector_store %arg3[%c0_14, %c0_15, %c0_16, %c0_17], %24 {strides = array<i32>} : memref<1x8x4x256xf32, #tpu.memory_space<vmem>>, vector<1x1x4x256xf32>,
    %c0_18 = arith.constant 0 : index
    %c256 = arith.constant 256 : index
    %25 = vector.load %arg4[%c0_18, %c256] : memref<12x2048xf32, #tpu.memory_space<vmem>>, vector<4x256xf32>
    %c4_19 = arith.constant 4 : index
    %c256_20 = arith.constant 256 : index
    %26 = vector.load %arg4[%c4_19, %c256_20] : memref<12x2048xf32, #tpu.memory_space<vmem>>, vector<4x256xf32>
    %27 = arith.mulf %26, %21 : vector<4x256xf32>
    %cst_21 = arith.constant 1.000000e+00 : f32
    %28 = vector.broadcast %cst_21 : f32 to vector<4x256xf32>
    %29 = arith.subf %28, %26 : vector<4x256xf32>
    %30 = arith.mulf %29, %25 : vector<4x256xf32>
    %31 = arith.addf %27, %30 : vector<4x256xf32>
    %c0_22 = arith.constant 0 : index
    %c1 = arith.constant 1 : index
    %c0_23 = arith.constant 0 : index
    %c0_24 = arith.constant 0 : index
    %32 = vector.load %arg3[%c0_22, %c1, %c0_23, %c0_24] : memref<1x8x4x256xf32, #tpu.memory_space<vmem>>, vector<1x1x4x256xf32>
    %33 = vector.shape_cast %32 : vector<1x1x4x256xf32> to vector<4x256xf32>
    %34 = vector.shape_cast %31 : vector<4x256xf32> to vector<1x1x4x256xf32>
    tpu.vector_store %arg3[%c0_22, %c1, %c0_23, %c0_24], %34 {strides = array<i32>} : memref<1x8x4x256xf32, #tpu.memory_space<vmem>>, vector<1x1x4x256xf32>,
    %c0_25 = arith.constant 0 : index
    %c512 = arith.constant 512 : index
    %35 = vector.load %arg4[%c0_25, %c512] : memref<12x2048xf32, #tpu.memory_space<vmem>>, vector<4x256xf32>
    %c4_26 = arith.constant 4 : index
    %c512_27 = arith.constant 512 : index
    %36 = vector.load %arg4[%c4_26, %c512_27] : memref<12x2048xf32, #tpu.memory_space<vmem>>, vector<4x256xf32>
    %37 = arith.mulf %36, %31 : vector<4x256xf32>
    %cst_28 = arith.constant 1.000000e+00 : f32
    %38 = vector.broadcast %cst_28 : f32 to vector<4x256xf32>
    %39 = arith.subf %38, %36 : vector<4x256xf32>
    %40 = arith.mulf %39, %35 : vector<4x256xf32>
    %41 = arith.addf %37, %40 : vector<4x256xf32>
    %c0_29 = arith.constant 0 : index
    %c2 = arith.constant 2 : index
    %c0_30 = arith.constant 0 : index
    %c0_31 = arith.constant 0 : index
    %42 = vector.load %arg3[%c0_29, %c2, %c0_30, %c0_31] : memref<1x8x4x256xf32, #tpu.memory_space<vmem>>, vector<1x1x4x256xf32>
    %43 = vector.shape_cast %42 : vector<1x1x4x256xf32> to vector<4x256xf32>
    %44 = vector.shape_cast %41 : vector<4x256xf32> to vector<1x1x4x256xf32>
    tpu.vector_store %arg3[%c0_29, %c2, %c0_30, %c0_31], %44 {strides = array<i32>} : memref<1x8x4x256xf32, #tpu.memory_space<vmem>>, vector<1x1x4x256xf32>,
    %c0_32 = arith.constant 0 : index
    %c768 = arith.constant 768 : index
    %45 = vector.load %arg4[%c0_32, %c768] : memref<12x2048xf32, #tpu.memory_space<vmem>>, vector<4x256xf32>
    %c4_33 = arith.constant 4 : index
    %c768_34 = arith.constant 768 : index
    %46 = vector.load %arg4[%c4_33, %c768_34] : memref<12x2048xf32, #tpu.memory_space<vmem>>, vector<4x256xf32>
    %47 = arith.mulf %46, %41 : vector<4x256xf32>
    %cst_35 = arith.constant 1.000000e+00 : f32
    %48 = vector.broadcast %cst_35 : f32 to vector<4x256xf32>
    %49 = arith.subf %48, %46 : vector<4x256xf32>
    %50 = arith.mulf %49, %45 : vector<4x256xf32>
    %51 = arith.addf %47, %50 : vector<4x256xf32>
    %c0_36 = arith.constant 0 : index
    %c3 = arith.constant 3 : index
    %c0_37 = arith.constant 0 : index
    %c0_38 = arith.constant 0 : index
    %52 = vector.load %arg3[%c0_36, %c3, %c0_37, %c0_38] : memref<1x8x4x256xf32, #tpu.memory_space<vmem>>, vector<1x1x4x256xf32>
    %53 = vector.shape_cast %52 : vector<1x1x4x256xf32> to vector<4x256xf32>
    %54 = vector.shape_cast %51 : vector<4x256xf32> to vector<1x1x4x256xf32>
    tpu.vector_store %arg3[%c0_36, %c3, %c0_37, %c0_38], %54 {strides = array<i32>} : memref<1x8x4x256xf32, #tpu.memory_space<vmem>>, vector<1x1x4x256xf32>,
    %c0_39 = arith.constant 0 : index
    %c1024 = arith.constant 1024 : index
    %55 = vector.load %arg4[%c0_39, %c1024] : memref<12x2048xf32, #tpu.memory_space<vmem>>, vector<4x256xf32>
    %c4_40 = arith.constant 4 : index
    %c1024_41 = arith.constant 1024 : index
    %56 = vector.load %arg4[%c4_40, %c1024_41] : memref<12x2048xf32, #tpu.memory_space<vmem>>, vector<4x256xf32>
    %57 = arith.mulf %56, %51 : vector<4x256xf32>
    %cst_42 = arith.constant 1.000000e+00 : f32
    %58 = vector.broadcast %cst_42 : f32 to vector<4x256xf32>
    %59 = arith.subf %58, %56 : vector<4x256xf32>
    %60 = arith.mulf %59, %55 : vector<4x256xf32>
    %61 = arith.addf %57, %60 : vector<4x256xf32>
    %c0_43 = arith.constant 0 : index
    %c4_44 = arith.constant 4 : index
    %c0_45 = arith.constant 0 : index
    %c0_46 = arith.constant 0 : index
    %62 = vector.load %arg3[%c0_43, %c4_44, %c0_45, %c0_46] : memref<1x8x4x256xf32, #tpu.memory_space<vmem>>, vector<1x1x4x256xf32>
    %63 = vector.shape_cast %62 : vector<1x1x4x256xf32> to vector<4x256xf32>
    %64 = vector.shape_cast %61 : vector<4x256xf32> to vector<1x1x4x256xf32>
    tpu.vector_store %arg3[%c0_43, %c4_44, %c0_45, %c0_46], %64 {strides = array<i32>} : memref<1x8x4x256xf32, #tpu.memory_space<vmem>>, vector<1x1x4x256xf32>,
    %c0_47 = arith.constant 0 : index
    %c1280 = arith.constant 1280 : index
    %65 = vector.load %arg4[%c0_47, %c1280] : memref<12x2048xf32, #tpu.memory_space<vmem>>, vector<4x256xf32>
    %c4_48 = arith.constant 4 : index
    %c1280_49 = arith.constant 1280 : index
    %66 = vector.load %arg4[%c4_48, %c1280_49] : memref<12x2048xf32, #tpu.memory_space<vmem>>, vector<4x256xf32>
    %67 = arith.mulf %66, %61 : vector<4x256xf32>
    %cst_50 = arith.constant 1.000000e+00 : f32
    %68 = vector.broadcast %cst_50 : f32 to vector<4x256xf32>
    %69 = arith.subf %68, %66 : vector<4x256xf32>
    %70 = arith.mulf %69, %65 : vector<4x256xf32>
    %71 = arith.addf %67, %70 : vector<4x256xf32>
    %c0_51 = arith.constant 0 : index
    %c5 = arith.constant 5 : index
    %c0_52 = arith.constant 0 : index
    %c0_53 = arith.constant 0 : index
    %72 = vector.load %arg3[%c0_51, %c5, %c0_52, %c0_53] : memref<1x8x4x256xf32, #tpu.memory_space<vmem>>, vector<1x1x4x256xf32>
    %73 = vector.shape_cast %72 : vector<1x1x4x256xf32> to vector<4x256xf32>
    %74 = vector.shape_cast %71 : vector<4x256xf32> to vector<1x1x4x256xf32>
    tpu.vector_store %arg3[%c0_51, %c5, %c0_52, %c0_53], %74 {strides = array<i32>} : memref<1x8x4x256xf32, #tpu.memory_space<vmem>>, vector<1x1x4x256xf32>,
    %c0_54 = arith.constant 0 : index
    %c1536 = arith.constant 1536 : index
    %75 = vector.load %arg4[%c0_54, %c1536] : memref<12x2048xf32, #tpu.memory_space<vmem>>, vector<4x256xf32>
    %c4_55 = arith.constant 4 : index
    %c1536_56 = arith.constant 1536 : index
    %76 = vector.load %arg4[%c4_55, %c1536_56] : memref<12x2048xf32, #tpu.memory_space<vmem>>, vector<4x256xf32>
    %77 = arith.mulf %76, %71 : vector<4x256xf32>
    %cst_57 = arith.constant 1.000000e+00 : f32
    %78 = vector.broadcast %cst_57 : f32 to vector<4x256xf32>
    %79 = arith.subf %78, %76 : vector<4x256xf32>
    %80 = arith.mulf %79, %75 : vector<4x256xf32>
    %81 = arith.addf %77, %80 : vector<4x256xf32>
    %c0_58 = arith.constant 0 : index
    %c6 = arith.constant 6 : index
    %c0_59 = arith.constant 0 : index
    %c0_60 = arith.constant 0 : index
    %82 = vector.load %arg3[%c0_58, %c6, %c0_59, %c0_60] : memref<1x8x4x256xf32, #tpu.memory_space<vmem>>, vector<1x1x4x256xf32>
    %83 = vector.shape_cast %82 : vector<1x1x4x256xf32> to vector<4x256xf32>
    %84 = vector.shape_cast %81 : vector<4x256xf32> to vector<1x1x4x256xf32>
    tpu.vector_store %arg3[%c0_58, %c6, %c0_59, %c0_60], %84 {strides = array<i32>} : memref<1x8x4x256xf32, #tpu.memory_space<vmem>>, vector<1x1x4x256xf32>,
    %c0_61 = arith.constant 0 : index
    %c1792 = arith.constant 1792 : index
    %85 = vector.load %arg4[%c0_61, %c1792] : memref<12x2048xf32, #tpu.memory_space<vmem>>, vector<4x256xf32>
    %c4_62 = arith.constant 4 : index
    %c1792_63 = arith.constant 1792 : index
    %86 = vector.load %arg4[%c4_62, %c1792_63] : memref<12x2048xf32, #tpu.memory_space<vmem>>, vector<4x256xf32>
    %87 = arith.mulf %86, %81 : vector<4x256xf32>
    %cst_64 = arith.constant 1.000000e+00 : f32
    %88 = vector.broadcast %cst_64 : f32 to vector<4x256xf32>
    %89 = arith.subf %88, %86 : vector<4x256xf32>
    %90 = arith.mulf %89, %85 : vector<4x256xf32>
    %91 = arith.addf %87, %90 : vector<4x256xf32>
    %c0_65 = arith.constant 0 : index
    %c7 = arith.constant 7 : index
    %c0_66 = arith.constant 0 : index
    %c0_67 = arith.constant 0 : index
    %92 = vector.load %arg3[%c0_65, %c7, %c0_66, %c0_67] : memref<1x8x4x256xf32, #tpu.memory_space<vmem>>, vector<1x1x4x256xf32>
    %93 = vector.shape_cast %92 : vector<1x1x4x256xf32> to vector<4x256xf32>
    %94 = vector.shape_cast %91 : vector<4x256xf32> to vector<1x1x4x256xf32>
    tpu.vector_store %arg3[%c0_65, %c7, %c0_66, %c0_67], %94 {strides = array<i32>} : memref<1x8x4x256xf32, #tpu.memory_space<vmem>>, vector<1x1x4x256xf32>,
    %cst_68 = arith.constant 0.000000e+00 : f32
    %95 = vector.broadcast %cst_68 : f32 to vector<4x256xf32>
    %c0_69 = arith.constant 0 : index
    %c1792_70 = arith.constant 1792 : index
    %96 = vector.load %arg4[%c0_69, %c1792_70] : memref<12x2048xf32, #tpu.memory_space<vmem>>, vector<4x256xf32>
    %c8 = arith.constant 8 : index
    %c1792_71 = arith.constant 1792 : index
    %97 = vector.load %arg4[%c8, %c1792_71] : memref<12x2048xf32, #tpu.memory_space<vmem>>, vector<4x256xf32>
    %98 = arith.mulf %97, %95 : vector<4x256xf32>
    %cst_72 = arith.constant 1.000000e+00 : f32
    %99 = vector.broadcast %cst_72 : f32 to vector<4x256xf32>
    %100 = arith.subf %99, %97 : vector<4x256xf32>
    %101 = arith.mulf %100, %96 : vector<4x256xf32>
    %102 = arith.addf %98, %101 : vector<4x256xf32>
    %c0_73 = arith.constant 0 : index
    %c7_74 = arith.constant 7 : index
    %c0_75 = arith.constant 0 : index
    %c0_76 = arith.constant 0 : index
    %103 = vector.load %arg3[%c0_73, %c7_74, %c0_75, %c0_76] : memref<1x8x4x256xf32, #tpu.memory_space<vmem>>, vector<1x1x4x256xf32>
    %104 = vector.shape_cast %103 : vector<1x1x4x256xf32> to vector<4x256xf32>
    %105 = arith.addf %104, %102 : vector<4x256xf32>
    %c0_77 = arith.constant 0 : index
    %c7_78 = arith.constant 7 : index
    %c0_79 = arith.constant 0 : index
    %c0_80 = arith.constant 0 : index
    %106 = vector.load %arg3[%c0_77, %c7_78, %c0_79, %c0_80] : memref<1x8x4x256xf32, #tpu.memory_space<vmem>>, vector<1x1x4x256xf32>
    %107 = vector.shape_cast %106 : vector<1x1x4x256xf32> to vector<4x256xf32>
    %108 = vector.shape_cast %105 : vector<4x256xf32> to vector<1x1x4x256xf32>
    tpu.vector_store %arg3[%c0_77, %c7_78, %c0_79, %c0_80], %108 {strides = array<i32>} : memref<1x8x4x256xf32, #tpu.memory_space<vmem>>, vector<1x1x4x256xf32>,
    %c0_81 = arith.constant 0 : index
    %c1536_82 = arith.constant 1536 : index
    %109 = vector.load %arg4[%c0_81, %c1536_82] : memref<12x2048xf32, #tpu.memory_space<vmem>>, vector<4x256xf32>
    %c8_83 = arith.constant 8 : index
    %c1536_84 = arith.constant 1536 : index
    %110 = vector.load %arg4[%c8_83, %c1536_84] : memref<12x2048xf32, #tpu.memory_space<vmem>>, vector<4x256xf32>
    %111 = arith.mulf %110, %102 : vector<4x256xf32>
    %cst_85 = arith.constant 1.000000e+00 : f32
    %112 = vector.broadcast %cst_85 : f32 to vector<4x256xf32>
    %113 = arith.subf %112, %110 : vector<4x256xf32>
    %114 = arith.mulf %113, %109 : vector<4x256xf32>
    %115 = arith.addf %111, %114 : vector<4x256xf32>
    %c0_86 = arith.constant 0 : index
    %c6_87 = arith.constant 6 : index
    %c0_88 = arith.constant 0 : index
    %c0_89 = arith.constant 0 : index
    %116 = vector.load %arg3[%c0_86, %c6_87, %c0_88, %c0_89] : memref<1x8x4x256xf32, #tpu.memory_space<vmem>>, vector<1x1x4x256xf32>
    %117 = vector.shape_cast %116 : vector<1x1x4x256xf32> to vector<4x256xf32>
    %118 = arith.addf %117, %115 : vector<4x256xf32>
    %c0_90 = arith.constant 0 : index
    %c6_91 = arith.constant 6 : index
    %c0_92 = arith.constant 0 : index
    %c0_93 = arith.constant 0 : index
    %119 = vector.load %arg3[%c0_90, %c6_91, %c0_92, %c0_93] : memref<1x8x4x256xf32, #tpu.memory_space<vmem>>, vector<1x1x4x256xf32>
    %120 = vector.shape_cast %119 : vector<1x1x4x256xf32> to vector<4x256xf32>
    %121 = vector.shape_cast %118 : vector<4x256xf32> to vector<1x1x4x256xf32>
    tpu.vector_store %arg3[%c0_90, %c6_91, %c0_92, %c0_93], %121 {strides = array<i32>} : memref<1x8x4x256xf32, #tpu.memory_space<vmem>>, vector<1x1x4x256xf32>,
    %c0_94 = arith.constant 0 : index
    %c1280_95 = arith.constant 1280 : index
    %122 = vector.load %arg4[%c0_94, %c1280_95] : memref<12x2048xf32, #tpu.memory_space<vmem>>, vector<4x256xf32>
    %c8_96 = arith.constant 8 : index
    %c1280_97 = arith.constant 1280 : index
    %123 = vector.load %arg4[%c8_96, %c1280_97] : memref<12x2048xf32, #tpu.memory_space<vmem>>, vector<4x256xf32>
    %124 = arith.mulf %123, %115 : vector<4x256xf32>
    %cst_98 = arith.constant 1.000000e+00 : f32
    %125 = vector.broadcast %cst_98 : f32 to vector<4x256xf32>
    %126 = arith.subf %125, %123 : vector<4x256xf32>
    %127 = arith.mulf %126, %122 : vector<4x256xf32>
    %128 = arith.addf %124, %127 : vector<4x256xf32>
    %c0_99 = arith.constant 0 : index
    %c5_100 = arith.constant 5 : index
    %c0_101 = arith.constant 0 : index
    %c0_102 = arith.constant 0 : index
    %129 = vector.load %arg3[%c0_99, %c5_100, %c0_101, %c0_102] : memref<1x8x4x256xf32, #tpu.memory_space<vmem>>, vector<1x1x4x256xf32>
    %130 = vector.shape_cast %129 : vector<1x1x4x256xf32> to vector<4x256xf32>
    %131 = arith.addf %130, %128 : vector<4x256xf32>
    %c0_103 = arith.constant 0 : index
    %c5_104 = arith.constant 5 : index
    %c0_105 = arith.constant 0 : index
    %c0_106 = arith.constant 0 : index
    %132 = vector.load %arg3[%c0_103, %c5_104, %c0_105, %c0_106] : memref<1x8x4x256xf32, #tpu.memory_space<vmem>>, vector<1x1x4x256xf32>
    %133 = vector.shape_cast %132 : vector<1x1x4x256xf32> to vector<4x256xf32>
    %134 = vector.shape_cast %131 : vector<4x256xf32> to vector<1x1x4x256xf32>
    tpu.vector_store %arg3[%c0_103, %c5_104, %c0_105, %c0_106], %134 {strides = array<i32>} : memref<1x8x4x256xf32, #tpu.memory_space<vmem>>, vector<1x1x4x256xf32>,
    %c0_107 = arith.constant 0 : index
    %c1024_108 = arith.constant 1024 : index
    %135 = vector.load %arg4[%c0_107, %c1024_108] : memref<12x2048xf32, #tpu.memory_space<vmem>>, vector<4x256xf32>
    %c8_109 = arith.constant 8 : index
    %c1024_110 = arith.constant 1024 : index
    %136 = vector.load %arg4[%c8_109, %c1024_110] : memref<12x2048xf32, #tpu.memory_space<vmem>>, vector<4x256xf32>
    %137 = arith.mulf %136, %128 : vector<4x256xf32>
    %cst_111 = arith.constant 1.000000e+00 : f32
    %138 = vector.broadcast %cst_111 : f32 to vector<4x256xf32>
    %139 = arith.subf %138, %136 : vector<4x256xf32>
    %140 = arith.mulf %139, %135 : vector<4x256xf32>
    %141 = arith.addf %137, %140 : vector<4x256xf32>
    %c0_112 = arith.constant 0 : index
    %c4_113 = arith.constant 4 : index
    %c0_114 = arith.constant 0 : index
    %c0_115 = arith.constant 0 : index
    %142 = vector.load %arg3[%c0_112, %c4_113, %c0_114, %c0_115] : memref<1x8x4x256xf32, #tpu.memory_space<vmem>>, vector<1x1x4x256xf32>
    %143 = vector.shape_cast %142 : vector<1x1x4x256xf32> to vector<4x256xf32>
    %144 = arith.addf %143, %141 : vector<4x256xf32>
    %c0_116 = arith.constant 0 : index
    %c4_117 = arith.constant 4 : index
    %c0_118 = arith.constant 0 : index
    %c0_119 = arith.constant 0 : index
    %145 = vector.load %arg3[%c0_116, %c4_117, %c0_118, %c0_119] : memref<1x8x4x256xf32, #tpu.memory_space<vmem>>, vector<1x1x4x256xf32>
    %146 = vector.shape_cast %145 : vector<1x1x4x256xf32> to vector<4x256xf32>
    %147 = vector.shape_cast %144 : vector<4x256xf32> to vector<1x1x4x256xf32>
    tpu.vector_store %arg3[%c0_116, %c4_117, %c0_118, %c0_119], %147 {strides = array<i32>} : memref<1x8x4x256xf32, #tpu.memory_space<vmem>>, vector<1x1x4x256xf32>,
    %c0_120 = arith.constant 0 : index
    %c768_121 = arith.constant 768 : index
    %148 = vector.load %arg4[%c0_120, %c768_121] : memref<12x2048xf32, #tpu.memory_space<vmem>>, vector<4x256xf32>
    %c8_122 = arith.constant 8 : index
    %c768_123 = arith.constant 768 : index
    %149 = vector.load %arg4[%c8_122, %c768_123] : memref<12x2048xf32, #tpu.memory_space<vmem>>, vector<4x256xf32>
    %150 = arith.mulf %149, %141 : vector<4x256xf32>
    %cst_124 = arith.constant 1.000000e+00 : f32
    %151 = vector.broadcast %cst_124 : f32 to vector<4x256xf32>
    %152 = arith.subf %151, %149 : vector<4x256xf32>
    %153 = arith.mulf %152, %148 : vector<4x256xf32>
    %154 = arith.addf %150, %153 : vector<4x256xf32>
    %c0_125 = arith.constant 0 : index
    %c3_126 = arith.constant 3 : index
    %c0_127 = arith.constant 0 : index
    %c0_128 = arith.constant 0 : index
    %155 = vector.load %arg3[%c0_125, %c3_126, %c0_127, %c0_128] : memref<1x8x4x256xf32, #tpu.memory_space<vmem>>, vector<1x1x4x256xf32>
    %156 = vector.shape_cast %155 : vector<1x1x4x256xf32> to vector<4x256xf32>
    %157 = arith.addf %156, %154 : vector<4x256xf32>
    %c0_129 = arith.constant 0 : index
    %c3_130 = arith.constant 3 : index
    %c0_131 = arith.constant 0 : index
    %c0_132 = arith.constant 0 : index
    %158 = vector.load %arg3[%c0_129, %c3_130, %c0_131, %c0_132] : memref<1x8x4x256xf32, #tpu.memory_space<vmem>>, vector<1x1x4x256xf32>
    %159 = vector.shape_cast %158 : vector<1x1x4x256xf32> to vector<4x256xf32>
    %160 = vector.shape_cast %157 : vector<4x256xf32> to vector<1x1x4x256xf32>
    tpu.vector_store %arg3[%c0_129, %c3_130, %c0_131, %c0_132], %160 {strides = array<i32>} : memref<1x8x4x256xf32, #tpu.memory_space<vmem>>, vector<1x1x4x256xf32>,
    %c0_133 = arith.constant 0 : index
    %c512_134 = arith.constant 512 : index
    %161 = vector.load %arg4[%c0_133, %c512_134] : memref<12x2048xf32, #tpu.memory_space<vmem>>, vector<4x256xf32>
    %c8_135 = arith.constant 8 : index
    %c512_136 = arith.constant 512 : index
    %162 = vector.load %arg4[%c8_135, %c512_136] : memref<12x2048xf32, #tpu.memory_space<vmem>>, vector<4x256xf32>
    %163 = arith.mulf %162, %154 : vector<4x256xf32>
    %cst_137 = arith.constant 1.000000e+00 : f32
    %164 = vector.broadcast %cst_137 : f32 to vector<4x256xf32>
    %165 = arith.subf %164, %162 : vector<4x256xf32>
    %166 = arith.mulf %165, %161 : vector<4x256xf32>
    %167 = arith.addf %163, %166 : vector<4x256xf32>
    %c0_138 = arith.constant 0 : index
    %c2_139 = arith.constant 2 : index
    %c0_140 = arith.constant 0 : index
    %c0_141 = arith.constant 0 : index
    %168 = vector.load %arg3[%c0_138, %c2_139, %c0_140, %c0_141] : memref<1x8x4x256xf32, #tpu.memory_space<vmem>>, vector<1x1x4x256xf32>
    %169 = vector.shape_cast %168 : vector<1x1x4x256xf32> to vector<4x256xf32>
    %170 = arith.addf %169, %167 : vector<4x256xf32>
    %c0_142 = arith.constant 0 : index
    %c2_143 = arith.constant 2 : index
    %c0_144 = arith.constant 0 : index
    %c0_145 = arith.constant 0 : index
    %171 = vector.load %arg3[%c0_142, %c2_143, %c0_144, %c0_145] : memref<1x8x4x256xf32, #tpu.memory_space<vmem>>, vector<1x1x4x256xf32>
    %172 = vector.shape_cast %171 : vector<1x1x4x256xf32> to vector<4x256xf32>
    %173 = vector.shape_cast %170 : vector<4x256xf32> to vector<1x1x4x256xf32>
    tpu.vector_store %arg3[%c0_142, %c2_143, %c0_144, %c0_145], %173 {strides = array<i32>} : memref<1x8x4x256xf32, #tpu.memory_space<vmem>>, vector<1x1x4x256xf32>,
    %c0_146 = arith.constant 0 : index
    %c256_147 = arith.constant 256 : index
    %174 = vector.load %arg4[%c0_146, %c256_147] : memref<12x2048xf32, #tpu.memory_space<vmem>>, vector<4x256xf32>
    %c8_148 = arith.constant 8 : index
    %c256_149 = arith.constant 256 : index
    %175 = vector.load %arg4[%c8_148, %c256_149] : memref<12x2048xf32, #tpu.memory_space<vmem>>, vector<4x256xf32>
    %176 = arith.mulf %175, %167 : vector<4x256xf32>
    %cst_150 = arith.constant 1.000000e+00 : f32
    %177 = vector.broadcast %cst_150 : f32 to vector<4x256xf32>
    %178 = arith.subf %177, %175 : vector<4x256xf32>
    %179 = arith.mulf %178, %174 : vector<4x256xf32>
    %180 = arith.addf %176, %179 : vector<4x256xf32>
    %c0_151 = arith.constant 0 : index
    %c1_152 = arith.constant 1 : index
    %c0_153 = arith.constant 0 : index
    %c0_154 = arith.constant 0 : index
    %181 = vector.load %arg3[%c0_151, %c1_152, %c0_153, %c0_154] : memref<1x8x4x256xf32, #tpu.memory_space<vmem>>, vector<1x1x4x256xf32>
    %182 = vector.shape_cast %181 : vector<1x1x4x256xf32> to vector<4x256xf32>
    %183 = arith.addf %182, %180 : vector<4x256xf32>
    %c0_155 = arith.constant 0 : index
    %c1_156 = arith.constant 1 : index
    %c0_157 = arith.constant 0 : index
    %c0_158 = arith.constant 0 : index
    %184 = vector.load %arg3[%c0_155, %c1_156, %c0_157, %c0_158] : memref<1x8x4x256xf32, #tpu.memory_space<vmem>>, vector<1x1x4x256xf32>
    %185 = vector.shape_cast %184 : vector<1x1x4x256xf32> to vector<4x256xf32>
    %186 = vector.shape_cast %183 : vector<4x256xf32> to vector<1x1x4x256xf32>
    tpu.vector_store %arg3[%c0_155, %c1_156, %c0_157, %c0_158], %186 {strides = array<i32>} : memref<1x8x4x256xf32, #tpu.memory_space<vmem>>, vector<1x1x4x256xf32>,
    %c0_159 = arith.constant 0 : index
    %c0_160 = arith.constant 0 : index
    %187 = vector.load %arg4[%c0_159, %c0_160] : memref<12x2048xf32, #tpu.memory_space<vmem>>, vector<4x256xf32>
    %c8_161 = arith.constant 8 : index
    %c0_162 = arith.constant 0 : index
    %188 = vector.load %arg4[%c8_161, %c0_162] : memref<12x2048xf32, #tpu.memory_space<vmem>>, vector<4x256xf32>
    %189 = arith.mulf %188, %180 : vector<4x256xf32>
    %cst_163 = arith.constant 1.000000e+00 : f32
    %190 = vector.broadcast %cst_163 : f32 to vector<4x256xf32>
    %191 = arith.subf %190, %188 : vector<4x256xf32>
    %192 = arith.mulf %191, %187 : vector<4x256xf32>
    %193 = arith.addf %189, %192 : vector<4x256xf32>
    %c0_164 = arith.constant 0 : index
    %c0_165 = arith.constant 0 : index
    %c0_166 = arith.constant 0 : index
    %c0_167 = arith.constant 0 : index
    %194 = vector.load %arg3[%c0_164, %c0_165, %c0_166, %c0_167] : memref<1x8x4x256xf32, #tpu.memory_space<vmem>>, vector<1x1x4x256xf32>
    %195 = vector.shape_cast %194 : vector<1x1x4x256xf32> to vector<4x256xf32>
    %196 = arith.addf %195, %193 : vector<4x256xf32>
    %c0_168 = arith.constant 0 : index
    %c0_169 = arith.constant 0 : index
    %c0_170 = arith.constant 0 : index
    %c0_171 = arith.constant 0 : index
    %197 = vector.load %arg3[%c0_168, %c0_169, %c0_170, %c0_171] : memref<1x8x4x256xf32, #tpu.memory_space<vmem>>, vector<1x1x4x256xf32>
    %198 = vector.shape_cast %197 : vector<1x1x4x256xf32> to vector<4x256xf32>
    %199 = vector.shape_cast %196 : vector<4x256xf32> to vector<1x1x4x256xf32>
    tpu.vector_store %arg3[%c0_168, %c0_169, %c0_170, %c0_171], %199 {strides = array<i32>} : memref<1x8x4x256xf32, #tpu.memory_space<vmem>>, vector<1x1x4x256xf32>,
    return
  }
  func.func @transform_0(%arg0: i32) -> (i32, i32, i32) {
    %c0_i32 = arith.constant 0 : i32
    %c0_i32_0 = arith.constant 0 : i32
    %c0_i32_1 = arith.constant 0 : i32
    return %arg0, %c0_i32, %c0_i32_0 : i32, i32, i32
  }
  func.func @transform_1(%arg0: i32) -> (i32, i32) {
    %c0_i32 = arith.constant 0 : i32
    %c0_i32_0 = arith.constant 0 : i32
    %c0_i32_1 = arith.constant 0 : i32
    return %c0_i32, %c0_i32_0 : i32, i32
  }
  func.func @transform_2(%arg0: i32) -> (i32, i32, i32, i32) {
    %c0_i32 = arith.constant 0 : i32
    %c0_i32_0 = arith.constant 0 : i32
    %c0_i32_1 = arith.constant 0 : i32
    %c0_i32_2 = arith.constant 0 : i32
    return %arg0, %c0_i32, %c0_i32_0, %c0_i32_1 : i32, i32, i32, i32
  }
}

module attributes {stable_mosaic.version = 11 : i64} {
  func.func @_fused_layer_kernel(%arg0: i32, %arg1: memref<1x112x1024xbf16, #tpu.memory_space<vmem>>, %arg2: memref<24x112xbf16, #tpu.memory_space<vmem>>, %arg3: memref<1x8x8x128xf32, #tpu.memory_space<vmem>>, %arg4: memref<24x1024xf32, #tpu.memory_space<vmem>>) attributes {dimension_semantics = [#tpu.dimension_semantics<parallel>], iteration_bounds = array<i64: 1>, scalar_prefetch = 0 : i64, scratch_operands = 1 : i64, tpu.core_type = #tpu.core_type<tc>, window_params = [{transform_indices = @transform_0, window_bounds = array<i64: 1, 112, 1024>}, {pipeline_mode = #tpu.pipeline_mode<synchronous>, transform_indices = @transform_1, window_bounds = array<i64: 24, 112>}, {transform_indices = @transform_2, window_bounds = array<i64: 1, 8, 8, 128>}]} {
    %c0 = arith.constant 0 : index
    %c0_0 = arith.constant 0 : index
    %0 = vector.load %arg2[%c0, %c0_0] : memref<24x112xbf16, #tpu.memory_space<vmem>>, vector<24x112xbf16>
    %c0_1 = arith.constant 0 : index
    %c0_2 = arith.constant 0 : index
    %c0_3 = arith.constant 0 : index
    %1 = vector.load %arg1[%c0_1, %c0_2, %c0_3] : memref<1x112x1024xbf16, #tpu.memory_space<vmem>>, vector<1x112x1024xbf16>
    %2 = vector.shape_cast %1 : vector<1x112x1024xbf16> to vector<112x1024xbf16>
    %cst = arith.constant dense<0.000000e+00> : vector<24x1024xf32>
    %3 = tpu.matmul %0, %2, %cst {dimension_numbers = #tpu.dot_dimension_numbers<[1], [0], [0], [1], [0, 0, 1, 1], [], []>} : vector<24x112xbf16>, vector<112x1024xbf16>, vector<24x1024xf32> -> vector<24x1024xf32>
    %4 = vector.extract_strided_slice %3 {offsets = [0, 0], sizes = [8, 1024], strides = [1, 1]} : vector<24x1024xf32> to vector<8x1024xf32>
    %5 = math.tanh %4 : vector<8x1024xf32>
    %c0_4 = arith.constant 0 : index
    %c0_5 = arith.constant 0 : index
    %6 = vector.load %arg4[%c0_4, %c0_5] : memref<24x1024xf32, #tpu.memory_space<vmem>>, vector<8x1024xf32>
    tpu.vector_store %arg4[%c0_4, %c0_5], %5 {strides = array<i32>} : memref<24x1024xf32, #tpu.memory_space<vmem>>, vector<8x1024xf32>,
    %7 = vector.extract_strided_slice %3 {offsets = [8, 0], sizes = [16, 1024], strides = [1, 1]} : vector<24x1024xf32> to vector<16x1024xf32>
    %8 = arith.negf %7 : vector<16x1024xf32>
    %9 = math.exp %8 : vector<16x1024xf32>
    %cst_6 = arith.constant 1.000000e+00 : f32
    %10 = vector.broadcast %cst_6 : f32 to vector<16x1024xf32>
    %11 = arith.addf %10, %9 : vector<16x1024xf32>
    %12 = arith.divf %10, %11 : vector<16x1024xf32>
    %c8 = arith.constant 8 : index
    %c0_7 = arith.constant 0 : index
    %13 = vector.load %arg4[%c8, %c0_7] : memref<24x1024xf32, #tpu.memory_space<vmem>>, vector<16x1024xf32>
    tpu.vector_store %arg4[%c8, %c0_7], %12 {strides = array<i32>} : memref<24x1024xf32, #tpu.memory_space<vmem>>, vector<16x1024xf32>,
    %cst_8 = arith.constant 0.000000e+00 : f32
    %14 = vector.broadcast %cst_8 : f32 to vector<8x128xf32>
    %c0_9 = arith.constant 0 : index
    %c0_10 = arith.constant 0 : index
    %15 = vector.load %arg4[%c0_9, %c0_10] : memref<24x1024xf32, #tpu.memory_space<vmem>>, vector<8x128xf32>
    %c8_11 = arith.constant 8 : index
    %c0_12 = arith.constant 0 : index
    %16 = vector.load %arg4[%c8_11, %c0_12] : memref<24x1024xf32, #tpu.memory_space<vmem>>, vector<8x128xf32>
    %17 = arith.mulf %16, %14 : vector<8x128xf32>
    %cst_13 = arith.constant 1.000000e+00 : f32
    %18 = vector.broadcast %cst_13 : f32 to vector<8x128xf32>
    %19 = arith.subf %18, %16 : vector<8x128xf32>
    %20 = arith.mulf %19, %15 : vector<8x128xf32>
    %21 = arith.addf %17, %20 : vector<8x128xf32>
    %c0_14 = arith.constant 0 : index
    %c0_15 = arith.constant 0 : index
    %c0_16 = arith.constant 0 : index
    %c0_17 = arith.constant 0 : index
    %22 = vector.load %arg3[%c0_14, %c0_15, %c0_16, %c0_17] : memref<1x8x8x128xf32, #tpu.memory_space<vmem>>, vector<1x1x8x128xf32>
    %23 = vector.shape_cast %22 : vector<1x1x8x128xf32> to vector<8x128xf32>
    %24 = vector.shape_cast %21 : vector<8x128xf32> to vector<1x1x8x128xf32>
    tpu.vector_store %arg3[%c0_14, %c0_15, %c0_16, %c0_17], %24 {strides = array<i32>} : memref<1x8x8x128xf32, #tpu.memory_space<vmem>>, vector<1x1x8x128xf32>,
    %c0_18 = arith.constant 0 : index
    %c128 = arith.constant 128 : index
    %25 = vector.load %arg4[%c0_18, %c128] : memref<24x1024xf32, #tpu.memory_space<vmem>>, vector<8x128xf32>
    %c8_19 = arith.constant 8 : index
    %c128_20 = arith.constant 128 : index
    %26 = vector.load %arg4[%c8_19, %c128_20] : memref<24x1024xf32, #tpu.memory_space<vmem>>, vector<8x128xf32>
    %27 = arith.mulf %26, %21 : vector<8x128xf32>
    %cst_21 = arith.constant 1.000000e+00 : f32
    %28 = vector.broadcast %cst_21 : f32 to vector<8x128xf32>
    %29 = arith.subf %28, %26 : vector<8x128xf32>
    %30 = arith.mulf %29, %25 : vector<8x128xf32>
    %31 = arith.addf %27, %30 : vector<8x128xf32>
    %c0_22 = arith.constant 0 : index
    %c1 = arith.constant 1 : index
    %c0_23 = arith.constant 0 : index
    %c0_24 = arith.constant 0 : index
    %32 = vector.load %arg3[%c0_22, %c1, %c0_23, %c0_24] : memref<1x8x8x128xf32, #tpu.memory_space<vmem>>, vector<1x1x8x128xf32>
    %33 = vector.shape_cast %32 : vector<1x1x8x128xf32> to vector<8x128xf32>
    %34 = vector.shape_cast %31 : vector<8x128xf32> to vector<1x1x8x128xf32>
    tpu.vector_store %arg3[%c0_22, %c1, %c0_23, %c0_24], %34 {strides = array<i32>} : memref<1x8x8x128xf32, #tpu.memory_space<vmem>>, vector<1x1x8x128xf32>,
    %c0_25 = arith.constant 0 : index
    %c256 = arith.constant 256 : index
    %35 = vector.load %arg4[%c0_25, %c256] : memref<24x1024xf32, #tpu.memory_space<vmem>>, vector<8x128xf32>
    %c8_26 = arith.constant 8 : index
    %c256_27 = arith.constant 256 : index
    %36 = vector.load %arg4[%c8_26, %c256_27] : memref<24x1024xf32, #tpu.memory_space<vmem>>, vector<8x128xf32>
    %37 = arith.mulf %36, %31 : vector<8x128xf32>
    %cst_28 = arith.constant 1.000000e+00 : f32
    %38 = vector.broadcast %cst_28 : f32 to vector<8x128xf32>
    %39 = arith.subf %38, %36 : vector<8x128xf32>
    %40 = arith.mulf %39, %35 : vector<8x128xf32>
    %41 = arith.addf %37, %40 : vector<8x128xf32>
    %c0_29 = arith.constant 0 : index
    %c2 = arith.constant 2 : index
    %c0_30 = arith.constant 0 : index
    %c0_31 = arith.constant 0 : index
    %42 = vector.load %arg3[%c0_29, %c2, %c0_30, %c0_31] : memref<1x8x8x128xf32, #tpu.memory_space<vmem>>, vector<1x1x8x128xf32>
    %43 = vector.shape_cast %42 : vector<1x1x8x128xf32> to vector<8x128xf32>
    %44 = vector.shape_cast %41 : vector<8x128xf32> to vector<1x1x8x128xf32>
    tpu.vector_store %arg3[%c0_29, %c2, %c0_30, %c0_31], %44 {strides = array<i32>} : memref<1x8x8x128xf32, #tpu.memory_space<vmem>>, vector<1x1x8x128xf32>,
    %c0_32 = arith.constant 0 : index
    %c384 = arith.constant 384 : index
    %45 = vector.load %arg4[%c0_32, %c384] : memref<24x1024xf32, #tpu.memory_space<vmem>>, vector<8x128xf32>
    %c8_33 = arith.constant 8 : index
    %c384_34 = arith.constant 384 : index
    %46 = vector.load %arg4[%c8_33, %c384_34] : memref<24x1024xf32, #tpu.memory_space<vmem>>, vector<8x128xf32>
    %47 = arith.mulf %46, %41 : vector<8x128xf32>
    %cst_35 = arith.constant 1.000000e+00 : f32
    %48 = vector.broadcast %cst_35 : f32 to vector<8x128xf32>
    %49 = arith.subf %48, %46 : vector<8x128xf32>
    %50 = arith.mulf %49, %45 : vector<8x128xf32>
    %51 = arith.addf %47, %50 : vector<8x128xf32>
    %c0_36 = arith.constant 0 : index
    %c3 = arith.constant 3 : index
    %c0_37 = arith.constant 0 : index
    %c0_38 = arith.constant 0 : index
    %52 = vector.load %arg3[%c0_36, %c3, %c0_37, %c0_38] : memref<1x8x8x128xf32, #tpu.memory_space<vmem>>, vector<1x1x8x128xf32>
    %53 = vector.shape_cast %52 : vector<1x1x8x128xf32> to vector<8x128xf32>
    %54 = vector.shape_cast %51 : vector<8x128xf32> to vector<1x1x8x128xf32>
    tpu.vector_store %arg3[%c0_36, %c3, %c0_37, %c0_38], %54 {strides = array<i32>} : memref<1x8x8x128xf32, #tpu.memory_space<vmem>>, vector<1x1x8x128xf32>,
    %c0_39 = arith.constant 0 : index
    %c512 = arith.constant 512 : index
    %55 = vector.load %arg4[%c0_39, %c512] : memref<24x1024xf32, #tpu.memory_space<vmem>>, vector<8x128xf32>
    %c8_40 = arith.constant 8 : index
    %c512_41 = arith.constant 512 : index
    %56 = vector.load %arg4[%c8_40, %c512_41] : memref<24x1024xf32, #tpu.memory_space<vmem>>, vector<8x128xf32>
    %57 = arith.mulf %56, %51 : vector<8x128xf32>
    %cst_42 = arith.constant 1.000000e+00 : f32
    %58 = vector.broadcast %cst_42 : f32 to vector<8x128xf32>
    %59 = arith.subf %58, %56 : vector<8x128xf32>
    %60 = arith.mulf %59, %55 : vector<8x128xf32>
    %61 = arith.addf %57, %60 : vector<8x128xf32>
    %c0_43 = arith.constant 0 : index
    %c4 = arith.constant 4 : index
    %c0_44 = arith.constant 0 : index
    %c0_45 = arith.constant 0 : index
    %62 = vector.load %arg3[%c0_43, %c4, %c0_44, %c0_45] : memref<1x8x8x128xf32, #tpu.memory_space<vmem>>, vector<1x1x8x128xf32>
    %63 = vector.shape_cast %62 : vector<1x1x8x128xf32> to vector<8x128xf32>
    %64 = vector.shape_cast %61 : vector<8x128xf32> to vector<1x1x8x128xf32>
    tpu.vector_store %arg3[%c0_43, %c4, %c0_44, %c0_45], %64 {strides = array<i32>} : memref<1x8x8x128xf32, #tpu.memory_space<vmem>>, vector<1x1x8x128xf32>,
    %c0_46 = arith.constant 0 : index
    %c640 = arith.constant 640 : index
    %65 = vector.load %arg4[%c0_46, %c640] : memref<24x1024xf32, #tpu.memory_space<vmem>>, vector<8x128xf32>
    %c8_47 = arith.constant 8 : index
    %c640_48 = arith.constant 640 : index
    %66 = vector.load %arg4[%c8_47, %c640_48] : memref<24x1024xf32, #tpu.memory_space<vmem>>, vector<8x128xf32>
    %67 = arith.mulf %66, %61 : vector<8x128xf32>
    %cst_49 = arith.constant 1.000000e+00 : f32
    %68 = vector.broadcast %cst_49 : f32 to vector<8x128xf32>
    %69 = arith.subf %68, %66 : vector<8x128xf32>
    %70 = arith.mulf %69, %65 : vector<8x128xf32>
    %71 = arith.addf %67, %70 : vector<8x128xf32>
    %c0_50 = arith.constant 0 : index
    %c5 = arith.constant 5 : index
    %c0_51 = arith.constant 0 : index
    %c0_52 = arith.constant 0 : index
    %72 = vector.load %arg3[%c0_50, %c5, %c0_51, %c0_52] : memref<1x8x8x128xf32, #tpu.memory_space<vmem>>, vector<1x1x8x128xf32>
    %73 = vector.shape_cast %72 : vector<1x1x8x128xf32> to vector<8x128xf32>
    %74 = vector.shape_cast %71 : vector<8x128xf32> to vector<1x1x8x128xf32>
    tpu.vector_store %arg3[%c0_50, %c5, %c0_51, %c0_52], %74 {strides = array<i32>} : memref<1x8x8x128xf32, #tpu.memory_space<vmem>>, vector<1x1x8x128xf32>,
    %c0_53 = arith.constant 0 : index
    %c768 = arith.constant 768 : index
    %75 = vector.load %arg4[%c0_53, %c768] : memref<24x1024xf32, #tpu.memory_space<vmem>>, vector<8x128xf32>
    %c8_54 = arith.constant 8 : index
    %c768_55 = arith.constant 768 : index
    %76 = vector.load %arg4[%c8_54, %c768_55] : memref<24x1024xf32, #tpu.memory_space<vmem>>, vector<8x128xf32>
    %77 = arith.mulf %76, %71 : vector<8x128xf32>
    %cst_56 = arith.constant 1.000000e+00 : f32
    %78 = vector.broadcast %cst_56 : f32 to vector<8x128xf32>
    %79 = arith.subf %78, %76 : vector<8x128xf32>
    %80 = arith.mulf %79, %75 : vector<8x128xf32>
    %81 = arith.addf %77, %80 : vector<8x128xf32>
    %c0_57 = arith.constant 0 : index
    %c6 = arith.constant 6 : index
    %c0_58 = arith.constant 0 : index
    %c0_59 = arith.constant 0 : index
    %82 = vector.load %arg3[%c0_57, %c6, %c0_58, %c0_59] : memref<1x8x8x128xf32, #tpu.memory_space<vmem>>, vector<1x1x8x128xf32>
    %83 = vector.shape_cast %82 : vector<1x1x8x128xf32> to vector<8x128xf32>
    %84 = vector.shape_cast %81 : vector<8x128xf32> to vector<1x1x8x128xf32>
    tpu.vector_store %arg3[%c0_57, %c6, %c0_58, %c0_59], %84 {strides = array<i32>} : memref<1x8x8x128xf32, #tpu.memory_space<vmem>>, vector<1x1x8x128xf32>,
    %c0_60 = arith.constant 0 : index
    %c896 = arith.constant 896 : index
    %85 = vector.load %arg4[%c0_60, %c896] : memref<24x1024xf32, #tpu.memory_space<vmem>>, vector<8x128xf32>
    %c8_61 = arith.constant 8 : index
    %c896_62 = arith.constant 896 : index
    %86 = vector.load %arg4[%c8_61, %c896_62] : memref<24x1024xf32, #tpu.memory_space<vmem>>, vector<8x128xf32>
    %87 = arith.mulf %86, %81 : vector<8x128xf32>
    %cst_63 = arith.constant 1.000000e+00 : f32
    %88 = vector.broadcast %cst_63 : f32 to vector<8x128xf32>
    %89 = arith.subf %88, %86 : vector<8x128xf32>
    %90 = arith.mulf %89, %85 : vector<8x128xf32>
    %91 = arith.addf %87, %90 : vector<8x128xf32>
    %c0_64 = arith.constant 0 : index
    %c7 = arith.constant 7 : index
    %c0_65 = arith.constant 0 : index
    %c0_66 = arith.constant 0 : index
    %92 = vector.load %arg3[%c0_64, %c7, %c0_65, %c0_66] : memref<1x8x8x128xf32, #tpu.memory_space<vmem>>, vector<1x1x8x128xf32>
    %93 = vector.shape_cast %92 : vector<1x1x8x128xf32> to vector<8x128xf32>
    %94 = vector.shape_cast %91 : vector<8x128xf32> to vector<1x1x8x128xf32>
    tpu.vector_store %arg3[%c0_64, %c7, %c0_65, %c0_66], %94 {strides = array<i32>} : memref<1x8x8x128xf32, #tpu.memory_space<vmem>>, vector<1x1x8x128xf32>,
    %cst_67 = arith.constant 0.000000e+00 : f32
    %95 = vector.broadcast %cst_67 : f32 to vector<8x128xf32>
    %c0_68 = arith.constant 0 : index
    %c896_69 = arith.constant 896 : index
    %96 = vector.load %arg4[%c0_68, %c896_69] : memref<24x1024xf32, #tpu.memory_space<vmem>>, vector<8x128xf32>
    %c16 = arith.constant 16 : index
    %c896_70 = arith.constant 896 : index
    %97 = vector.load %arg4[%c16, %c896_70] : memref<24x1024xf32, #tpu.memory_space<vmem>>, vector<8x128xf32>
    %98 = arith.mulf %97, %95 : vector<8x128xf32>
    %cst_71 = arith.constant 1.000000e+00 : f32
    %99 = vector.broadcast %cst_71 : f32 to vector<8x128xf32>
    %100 = arith.subf %99, %97 : vector<8x128xf32>
    %101 = arith.mulf %100, %96 : vector<8x128xf32>
    %102 = arith.addf %98, %101 : vector<8x128xf32>
    %c0_72 = arith.constant 0 : index
    %c7_73 = arith.constant 7 : index
    %c0_74 = arith.constant 0 : index
    %c0_75 = arith.constant 0 : index
    %103 = vector.load %arg3[%c0_72, %c7_73, %c0_74, %c0_75] : memref<1x8x8x128xf32, #tpu.memory_space<vmem>>, vector<1x1x8x128xf32>
    %104 = vector.shape_cast %103 : vector<1x1x8x128xf32> to vector<8x128xf32>
    %105 = arith.addf %104, %102 : vector<8x128xf32>
    %c0_76 = arith.constant 0 : index
    %c7_77 = arith.constant 7 : index
    %c0_78 = arith.constant 0 : index
    %c0_79 = arith.constant 0 : index
    %106 = vector.load %arg3[%c0_76, %c7_77, %c0_78, %c0_79] : memref<1x8x8x128xf32, #tpu.memory_space<vmem>>, vector<1x1x8x128xf32>
    %107 = vector.shape_cast %106 : vector<1x1x8x128xf32> to vector<8x128xf32>
    %108 = vector.shape_cast %105 : vector<8x128xf32> to vector<1x1x8x128xf32>
    tpu.vector_store %arg3[%c0_76, %c7_77, %c0_78, %c0_79], %108 {strides = array<i32>} : memref<1x8x8x128xf32, #tpu.memory_space<vmem>>, vector<1x1x8x128xf32>,
    %c0_80 = arith.constant 0 : index
    %c768_81 = arith.constant 768 : index
    %109 = vector.load %arg4[%c0_80, %c768_81] : memref<24x1024xf32, #tpu.memory_space<vmem>>, vector<8x128xf32>
    %c16_82 = arith.constant 16 : index
    %c768_83 = arith.constant 768 : index
    %110 = vector.load %arg4[%c16_82, %c768_83] : memref<24x1024xf32, #tpu.memory_space<vmem>>, vector<8x128xf32>
    %111 = arith.mulf %110, %102 : vector<8x128xf32>
    %cst_84 = arith.constant 1.000000e+00 : f32
    %112 = vector.broadcast %cst_84 : f32 to vector<8x128xf32>
    %113 = arith.subf %112, %110 : vector<8x128xf32>
    %114 = arith.mulf %113, %109 : vector<8x128xf32>
    %115 = arith.addf %111, %114 : vector<8x128xf32>
    %c0_85 = arith.constant 0 : index
    %c6_86 = arith.constant 6 : index
    %c0_87 = arith.constant 0 : index
    %c0_88 = arith.constant 0 : index
    %116 = vector.load %arg3[%c0_85, %c6_86, %c0_87, %c0_88] : memref<1x8x8x128xf32, #tpu.memory_space<vmem>>, vector<1x1x8x128xf32>
    %117 = vector.shape_cast %116 : vector<1x1x8x128xf32> to vector<8x128xf32>
    %118 = arith.addf %117, %115 : vector<8x128xf32>
    %c0_89 = arith.constant 0 : index
    %c6_90 = arith.constant 6 : index
    %c0_91 = arith.constant 0 : index
    %c0_92 = arith.constant 0 : index
    %119 = vector.load %arg3[%c0_89, %c6_90, %c0_91, %c0_92] : memref<1x8x8x128xf32, #tpu.memory_space<vmem>>, vector<1x1x8x128xf32>
    %120 = vector.shape_cast %119 : vector<1x1x8x128xf32> to vector<8x128xf32>
    %121 = vector.shape_cast %118 : vector<8x128xf32> to vector<1x1x8x128xf32>
    tpu.vector_store %arg3[%c0_89, %c6_90, %c0_91, %c0_92], %121 {strides = array<i32>} : memref<1x8x8x128xf32, #tpu.memory_space<vmem>>, vector<1x1x8x128xf32>,
    %c0_93 = arith.constant 0 : index
    %c640_94 = arith.constant 640 : index
    %122 = vector.load %arg4[%c0_93, %c640_94] : memref<24x1024xf32, #tpu.memory_space<vmem>>, vector<8x128xf32>
    %c16_95 = arith.constant 16 : index
    %c640_96 = arith.constant 640 : index
    %123 = vector.load %arg4[%c16_95, %c640_96] : memref<24x1024xf32, #tpu.memory_space<vmem>>, vector<8x128xf32>
    %124 = arith.mulf %123, %115 : vector<8x128xf32>
    %cst_97 = arith.constant 1.000000e+00 : f32
    %125 = vector.broadcast %cst_97 : f32 to vector<8x128xf32>
    %126 = arith.subf %125, %123 : vector<8x128xf32>
    %127 = arith.mulf %126, %122 : vector<8x128xf32>
    %128 = arith.addf %124, %127 : vector<8x128xf32>
    %c0_98 = arith.constant 0 : index
    %c5_99 = arith.constant 5 : index
    %c0_100 = arith.constant 0 : index
    %c0_101 = arith.constant 0 : index
    %129 = vector.load %arg3[%c0_98, %c5_99, %c0_100, %c0_101] : memref<1x8x8x128xf32, #tpu.memory_space<vmem>>, vector<1x1x8x128xf32>
    %130 = vector.shape_cast %129 : vector<1x1x8x128xf32> to vector<8x128xf32>
    %131 = arith.addf %130, %128 : vector<8x128xf32>
    %c0_102 = arith.constant 0 : index
    %c5_103 = arith.constant 5 : index
    %c0_104 = arith.constant 0 : index
    %c0_105 = arith.constant 0 : index
    %132 = vector.load %arg3[%c0_102, %c5_103, %c0_104, %c0_105] : memref<1x8x8x128xf32, #tpu.memory_space<vmem>>, vector<1x1x8x128xf32>
    %133 = vector.shape_cast %132 : vector<1x1x8x128xf32> to vector<8x128xf32>
    %134 = vector.shape_cast %131 : vector<8x128xf32> to vector<1x1x8x128xf32>
    tpu.vector_store %arg3[%c0_102, %c5_103, %c0_104, %c0_105], %134 {strides = array<i32>} : memref<1x8x8x128xf32, #tpu.memory_space<vmem>>, vector<1x1x8x128xf32>,
    %c0_106 = arith.constant 0 : index
    %c512_107 = arith.constant 512 : index
    %135 = vector.load %arg4[%c0_106, %c512_107] : memref<24x1024xf32, #tpu.memory_space<vmem>>, vector<8x128xf32>
    %c16_108 = arith.constant 16 : index
    %c512_109 = arith.constant 512 : index
    %136 = vector.load %arg4[%c16_108, %c512_109] : memref<24x1024xf32, #tpu.memory_space<vmem>>, vector<8x128xf32>
    %137 = arith.mulf %136, %128 : vector<8x128xf32>
    %cst_110 = arith.constant 1.000000e+00 : f32
    %138 = vector.broadcast %cst_110 : f32 to vector<8x128xf32>
    %139 = arith.subf %138, %136 : vector<8x128xf32>
    %140 = arith.mulf %139, %135 : vector<8x128xf32>
    %141 = arith.addf %137, %140 : vector<8x128xf32>
    %c0_111 = arith.constant 0 : index
    %c4_112 = arith.constant 4 : index
    %c0_113 = arith.constant 0 : index
    %c0_114 = arith.constant 0 : index
    %142 = vector.load %arg3[%c0_111, %c4_112, %c0_113, %c0_114] : memref<1x8x8x128xf32, #tpu.memory_space<vmem>>, vector<1x1x8x128xf32>
    %143 = vector.shape_cast %142 : vector<1x1x8x128xf32> to vector<8x128xf32>
    %144 = arith.addf %143, %141 : vector<8x128xf32>
    %c0_115 = arith.constant 0 : index
    %c4_116 = arith.constant 4 : index
    %c0_117 = arith.constant 0 : index
    %c0_118 = arith.constant 0 : index
    %145 = vector.load %arg3[%c0_115, %c4_116, %c0_117, %c0_118] : memref<1x8x8x128xf32, #tpu.memory_space<vmem>>, vector<1x1x8x128xf32>
    %146 = vector.shape_cast %145 : vector<1x1x8x128xf32> to vector<8x128xf32>
    %147 = vector.shape_cast %144 : vector<8x128xf32> to vector<1x1x8x128xf32>
    tpu.vector_store %arg3[%c0_115, %c4_116, %c0_117, %c0_118], %147 {strides = array<i32>} : memref<1x8x8x128xf32, #tpu.memory_space<vmem>>, vector<1x1x8x128xf32>,
    %c0_119 = arith.constant 0 : index
    %c384_120 = arith.constant 384 : index
    %148 = vector.load %arg4[%c0_119, %c384_120] : memref<24x1024xf32, #tpu.memory_space<vmem>>, vector<8x128xf32>
    %c16_121 = arith.constant 16 : index
    %c384_122 = arith.constant 384 : index
    %149 = vector.load %arg4[%c16_121, %c384_122] : memref<24x1024xf32, #tpu.memory_space<vmem>>, vector<8x128xf32>
    %150 = arith.mulf %149, %141 : vector<8x128xf32>
    %cst_123 = arith.constant 1.000000e+00 : f32
    %151 = vector.broadcast %cst_123 : f32 to vector<8x128xf32>
    %152 = arith.subf %151, %149 : vector<8x128xf32>
    %153 = arith.mulf %152, %148 : vector<8x128xf32>
    %154 = arith.addf %150, %153 : vector<8x128xf32>
    %c0_124 = arith.constant 0 : index
    %c3_125 = arith.constant 3 : index
    %c0_126 = arith.constant 0 : index
    %c0_127 = arith.constant 0 : index
    %155 = vector.load %arg3[%c0_124, %c3_125, %c0_126, %c0_127] : memref<1x8x8x128xf32, #tpu.memory_space<vmem>>, vector<1x1x8x128xf32>
    %156 = vector.shape_cast %155 : vector<1x1x8x128xf32> to vector<8x128xf32>
    %157 = arith.addf %156, %154 : vector<8x128xf32>
    %c0_128 = arith.constant 0 : index
    %c3_129 = arith.constant 3 : index
    %c0_130 = arith.constant 0 : index
    %c0_131 = arith.constant 0 : index
    %158 = vector.load %arg3[%c0_128, %c3_129, %c0_130, %c0_131] : memref<1x8x8x128xf32, #tpu.memory_space<vmem>>, vector<1x1x8x128xf32>
    %159 = vector.shape_cast %158 : vector<1x1x8x128xf32> to vector<8x128xf32>
    %160 = vector.shape_cast %157 : vector<8x128xf32> to vector<1x1x8x128xf32>
    tpu.vector_store %arg3[%c0_128, %c3_129, %c0_130, %c0_131], %160 {strides = array<i32>} : memref<1x8x8x128xf32, #tpu.memory_space<vmem>>, vector<1x1x8x128xf32>,
    %c0_132 = arith.constant 0 : index
    %c256_133 = arith.constant 256 : index
    %161 = vector.load %arg4[%c0_132, %c256_133] : memref<24x1024xf32, #tpu.memory_space<vmem>>, vector<8x128xf32>
    %c16_134 = arith.constant 16 : index
    %c256_135 = arith.constant 256 : index
    %162 = vector.load %arg4[%c16_134, %c256_135] : memref<24x1024xf32, #tpu.memory_space<vmem>>, vector<8x128xf32>
    %163 = arith.mulf %162, %154 : vector<8x128xf32>
    %cst_136 = arith.constant 1.000000e+00 : f32
    %164 = vector.broadcast %cst_136 : f32 to vector<8x128xf32>
    %165 = arith.subf %164, %162 : vector<8x128xf32>
    %166 = arith.mulf %165, %161 : vector<8x128xf32>
    %167 = arith.addf %163, %166 : vector<8x128xf32>
    %c0_137 = arith.constant 0 : index
    %c2_138 = arith.constant 2 : index
    %c0_139 = arith.constant 0 : index
    %c0_140 = arith.constant 0 : index
    %168 = vector.load %arg3[%c0_137, %c2_138, %c0_139, %c0_140] : memref<1x8x8x128xf32, #tpu.memory_space<vmem>>, vector<1x1x8x128xf32>
    %169 = vector.shape_cast %168 : vector<1x1x8x128xf32> to vector<8x128xf32>
    %170 = arith.addf %169, %167 : vector<8x128xf32>
    %c0_141 = arith.constant 0 : index
    %c2_142 = arith.constant 2 : index
    %c0_143 = arith.constant 0 : index
    %c0_144 = arith.constant 0 : index
    %171 = vector.load %arg3[%c0_141, %c2_142, %c0_143, %c0_144] : memref<1x8x8x128xf32, #tpu.memory_space<vmem>>, vector<1x1x8x128xf32>
    %172 = vector.shape_cast %171 : vector<1x1x8x128xf32> to vector<8x128xf32>
    %173 = vector.shape_cast %170 : vector<8x128xf32> to vector<1x1x8x128xf32>
    tpu.vector_store %arg3[%c0_141, %c2_142, %c0_143, %c0_144], %173 {strides = array<i32>} : memref<1x8x8x128xf32, #tpu.memory_space<vmem>>, vector<1x1x8x128xf32>,
    %c0_145 = arith.constant 0 : index
    %c128_146 = arith.constant 128 : index
    %174 = vector.load %arg4[%c0_145, %c128_146] : memref<24x1024xf32, #tpu.memory_space<vmem>>, vector<8x128xf32>
    %c16_147 = arith.constant 16 : index
    %c128_148 = arith.constant 128 : index
    %175 = vector.load %arg4[%c16_147, %c128_148] : memref<24x1024xf32, #tpu.memory_space<vmem>>, vector<8x128xf32>
    %176 = arith.mulf %175, %167 : vector<8x128xf32>
    %cst_149 = arith.constant 1.000000e+00 : f32
    %177 = vector.broadcast %cst_149 : f32 to vector<8x128xf32>
    %178 = arith.subf %177, %175 : vector<8x128xf32>
    %179 = arith.mulf %178, %174 : vector<8x128xf32>
    %180 = arith.addf %176, %179 : vector<8x128xf32>
    %c0_150 = arith.constant 0 : index
    %c1_151 = arith.constant 1 : index
    %c0_152 = arith.constant 0 : index
    %c0_153 = arith.constant 0 : index
    %181 = vector.load %arg3[%c0_150, %c1_151, %c0_152, %c0_153] : memref<1x8x8x128xf32, #tpu.memory_space<vmem>>, vector<1x1x8x128xf32>
    %182 = vector.shape_cast %181 : vector<1x1x8x128xf32> to vector<8x128xf32>
    %183 = arith.addf %182, %180 : vector<8x128xf32>
    %c0_154 = arith.constant 0 : index
    %c1_155 = arith.constant 1 : index
    %c0_156 = arith.constant 0 : index
    %c0_157 = arith.constant 0 : index
    %184 = vector.load %arg3[%c0_154, %c1_155, %c0_156, %c0_157] : memref<1x8x8x128xf32, #tpu.memory_space<vmem>>, vector<1x1x8x128xf32>
    %185 = vector.shape_cast %184 : vector<1x1x8x128xf32> to vector<8x128xf32>
    %186 = vector.shape_cast %183 : vector<8x128xf32> to vector<1x1x8x128xf32>
    tpu.vector_store %arg3[%c0_154, %c1_155, %c0_156, %c0_157], %186 {strides = array<i32>} : memref<1x8x8x128xf32, #tpu.memory_space<vmem>>, vector<1x1x8x128xf32>,
    %c0_158 = arith.constant 0 : index
    %c0_159 = arith.constant 0 : index
    %187 = vector.load %arg4[%c0_158, %c0_159] : memref<24x1024xf32, #tpu.memory_space<vmem>>, vector<8x128xf32>
    %c16_160 = arith.constant 16 : index
    %c0_161 = arith.constant 0 : index
    %188 = vector.load %arg4[%c16_160, %c0_161] : memref<24x1024xf32, #tpu.memory_space<vmem>>, vector<8x128xf32>
    %189 = arith.mulf %188, %180 : vector<8x128xf32>
    %cst_162 = arith.constant 1.000000e+00 : f32
    %190 = vector.broadcast %cst_162 : f32 to vector<8x128xf32>
    %191 = arith.subf %190, %188 : vector<8x128xf32>
    %192 = arith.mulf %191, %187 : vector<8x128xf32>
    %193 = arith.addf %189, %192 : vector<8x128xf32>
    %c0_163 = arith.constant 0 : index
    %c0_164 = arith.constant 0 : index
    %c0_165 = arith.constant 0 : index
    %c0_166 = arith.constant 0 : index
    %194 = vector.load %arg3[%c0_163, %c0_164, %c0_165, %c0_166] : memref<1x8x8x128xf32, #tpu.memory_space<vmem>>, vector<1x1x8x128xf32>
    %195 = vector.shape_cast %194 : vector<1x1x8x128xf32> to vector<8x128xf32>
    %196 = arith.addf %195, %193 : vector<8x128xf32>
    %c0_167 = arith.constant 0 : index
    %c0_168 = arith.constant 0 : index
    %c0_169 = arith.constant 0 : index
    %c0_170 = arith.constant 0 : index
    %197 = vector.load %arg3[%c0_167, %c0_168, %c0_169, %c0_170] : memref<1x8x8x128xf32, #tpu.memory_space<vmem>>, vector<1x1x8x128xf32>
    %198 = vector.shape_cast %197 : vector<1x1x8x128xf32> to vector<8x128xf32>
    %199 = vector.shape_cast %196 : vector<8x128xf32> to vector<1x1x8x128xf32>
    tpu.vector_store %arg3[%c0_167, %c0_168, %c0_169, %c0_170], %199 {strides = array<i32>} : memref<1x8x8x128xf32, #tpu.memory_space<vmem>>, vector<1x1x8x128xf32>,
    return
  }
  func.func @transform_0(%arg0: i32) -> (i32, i32, i32) {
    %c0_i32 = arith.constant 0 : i32
    %c0_i32_0 = arith.constant 0 : i32
    %c0_i32_1 = arith.constant 0 : i32
    return %arg0, %c0_i32, %c0_i32_0 : i32, i32, i32
  }
  func.func @transform_1(%arg0: i32) -> (i32, i32) {
    %c0_i32 = arith.constant 0 : i32
    %c0_i32_0 = arith.constant 0 : i32
    %c0_i32_1 = arith.constant 0 : i32
    return %c0_i32, %c0_i32_0 : i32, i32
  }
  func.func @transform_2(%arg0: i32) -> (i32, i32, i32, i32) {
    %c0_i32 = arith.constant 0 : i32
    %c0_i32_0 = arith.constant 0 : i32
    %c0_i32_1 = arith.constant 0 : i32
    %c0_i32_2 = arith.constant 0 : i32
    return %arg0, %c0_i32, %c0_i32_0, %c0_i32_1 : i32, i32, i32, i32
  }
}

</mosaic_0001>

<bundles_post_ra>
// kernel: _encoder_jit.2
= control target key start
LH: loop header
LB: loop body
LE: loop exit
PB: predicated region body
PF: predicated region fallthrough
CT: control target
= control target key end

     0   :  { %s2206_s9 = smov 0   ;;  %s2432_s0 = inlined_call_operand.vmem [shape: bf16[2,112,2048], index: 0, kind: input, shape index: {}]   ;;  %s2433_s1 = inlined_call_operand.vmem [shape: bf16[12,112], index: 1, kind: input, shape index: {}]   ;;  %s2434_s2 = inlined_call_operand.vmem [shape: f32[2,8,4,256], index: 2, kind: output, shape index: {}]  }
   0x1 LB: > { %s1826_s10 = sadd.s32 4294967295, %s2188_s9   ;;  %p1830_p0 = scmp.ge.s32.totalorder %s2188_s9, 1  ;;  %s2188_s9 = sphi %s2206_s9, %s12_s9  }
   0x2   : > { %p112_p1 = scmp.lt.s32.totalorder %s2188_s9, 3 }
   0x4   : > { %p113_p2 = pnand %p1830_p0, %p112_p1 }
   0x5   : > { %p134_p3 = scmp.lt.s32.totalorder (!%p113_p2), %s1826_s10, 1  ;;  %v2190_v0 = vmov (!%p113_p2), 0   ;;  %vm824_vm0 = vcmask (!%p113_p2), 916480  }
   0x6   : > { %116 = sbr.rel (%p113_p2) target bundleno = 427 (0x1ab), region = 28  ;;  %860 = vmatprep.mubr.bf16.mxu0 (!%p113_p2), %v2190_v0  ;;  %903 = vmatprep.mubr.bf16.mxu1 (!%p113_p2), %v2190_v0 }
   0xd   : > { %s2436_s10 = smov (!%p134_p3, %s1826_s10), 1 }
   0xe   : > { %s2011_s11 = smul.u32 896, %s2436_s10  ;;  %s2010_s17 = sshll.u32 %s2436_s10, 6 }
   0xf   : > { %s2406_s20 = scalar_lea.vmem %s2434_s2, %s2010_s17 }
  0x10   : > { %s2222_s14 = scalar_lea.vmem %s2432_s0, %s2011_s11 }
  0x11   : > { %v147_v1 = vld [vmem:[%s2222_s14] sm:$0xff]  ;;  %v148_v3 = vld [vmem:[%s2222_s14 + $0x8] sm:$0xff]  ;;  %v149_v55 = vld [vmem:[%s2222_s14 + $0x10] sm:$0xff] }
  0x12   : > { %v155_v2 = vld [vmem:[%s2222_s14 + $0x40] sm:$0xff]  ;;  %v156_v5 = vld [vmem:[%s2222_s14 + $0x48] sm:$0xff]  ;;  %v157_v56 = vld [vmem:[%s2222_s14 + $0x50] sm:$0xff] }
  0x13   : > { %v1836_v4 = vcombine.high %v147_v1, %v155_v2  ;;  %v1835_v6 = vcombine.low %v147_v1, %v155_v2  ;;  %v163_v7 = vld [vmem:[%s2222_s14 + $0x80] sm:$0xff]  ;;  %v1838_v9 = vcombine.high %v148_v3, %v156_v5  ;;  %v1837_v10 = vcombine.low %v148_v3, %v156_v5  ;;  %v164_v12 = vld [vmem:[%s2222_s14 + $0x88] sm:$0xff]  ;;  %v150_v57 = vld [vmem:[%s2222_s14 + $0x18] sm:$0xff] }
  0x14   : > { %v171_v8 = vld [vmem:[%s2222_s14 + $0xc0] sm:$0xff]  ;;  %v172_v13 = vld [vmem:[%s2222_s14 + $0xc8] sm:$0xff]  ;;  %v158_v58 = vld [vmem:[%s2222_s14 + $0x58] sm:$0xff]  ;;  %v1840_v61 = vcombine.high %v149_v55, %v157_v56  ;;  %v1839_v5 = vcombine.low %v149_v55, %v157_v56 }
  0x15   : > { %v1852_v11 = vcombine.high %v163_v7, %v171_v8  ;;  %v179_v14 = vld [vmem:[%s2222_s14 + $0x100] sm:$0xff]  ;;  %828 = vmatprep.subr.bf16.mxu0 %v1836_v4  ;;  %v1854_v15 = vcombine.high %v164_v12, %v172_v13  ;;  %v180_v17 = vld [vmem:[%s2222_s14 + $0x108] sm:$0xff]  ;;  %871 = vmatprep.subr.bf16.mxu1 %v1838_v9  ;;  %v1851_v19 = vcombine.low %v163_v7, %v171_v8  ;;  %v165_v63 = vld [vmem:[%s2222_s14 + $0x90] sm:$0xff] }
  0x16   : > { %v187_v16 = vld [vmem:[%s2222_s14 + $0x140] sm:$0xff]  ;;  %v188_v18 = vld [vmem:[%s2222_s14 + $0x148] sm:$0xff]  ;;  %829 = vmatpush1.bf16.msra.mxu0 %v1835_v6  ;;  %872 = vmatpush1.bf16.msra.mxu1 %v1837_v10  ;;  %v1853_v20 = vcombine.low %v164_v12, %v172_v13  ;;  %v1842_v62 = vcombine.high %v150_v57, %v158_v58  ;;  %v173_v1 = vld [vmem:[%s2222_s14 + $0xd0] sm:$0xff]  ;;  %v1841_v6 = vcombine.low %v150_v57, %v158_v58 }
  0x17   : > { %830 = vmatprep.subr.bf16.mxu0 %v1852_v11  ;;  %v1868_v21 = vcombine.high %v179_v14, %v187_v16  ;;  %873 = vmatprep.subr.bf16.mxu1 %v1854_v15  ;;  %v1870_v22 = vcombine.high %v180_v17, %v188_v18  ;;  %v195_v23 = vld [vmem:[%s2222_s14 + $0x180] sm:$0xff]  ;;  %v196_v25 = vld [vmem:[%s2222_s14 + $0x188] sm:$0xff]  ;;  %v1867_v27 = vcombine.low %v179_v14, %v187_v16  ;;  %v166_v3 = vld [vmem:[%s2222_s14 + $0x98] sm:$0xff] }
  0x18   : > { %v203_v24 = vld [vmem:[%s2222_s14 + $0x1c0] sm:$0xff]  ;;  %v204_v26 = vld [vmem:[%s2222_s14 + $0x1c8] sm:$0xff]  ;;  %v1869_v28 = vcombine.low %v180_v17, %v188_v18  ;;  %v174_v4 = vld [vmem:[%s2222_s14 + $0xd8] sm:$0xff]  ;;  %v1856_v7 = vcombine.high %v165_v63, %v173_v1  ;;  %v1855_v13 = vcombine.low %v165_v63, %v173_v1 }
  0x19   : > { %v1884_v29 = vcombine.high %v195_v23, %v203_v24  ;;  %v1886_v30 = vcombine.high %v196_v25, %v204_v26  ;;  %v211_v31 = vld [vmem:[%s2222_s14 + $0x200] sm:$0xff]  ;;  %v212_v33 = vld [vmem:[%s2222_s14 + $0x208] sm:$0xff]  ;;  %v1883_v35 = vcombine.low %v195_v23, %v203_v24  ;;  %v1885_v36 = vcombine.low %v196_v25, %v204_v26  ;;  %v181_v9 = vld [vmem:[%s2222_s14 + $0x110] sm:$0xff] }
  0x1a   : > { %831 = vmatpush1.bf16.msra.mxu0 %v1851_v19  ;;  %874 = vmatpush1.bf16.msra.mxu1 %v1853_v20  ;;  %v219_v32 = vld [vmem:[%s2222_s14 + $0x240] sm:$0xff]  ;;  %v220_v34 = vld [vmem:[%s2222_s14 + $0x248] sm:$0xff]  ;;  %v1858_v8 = vcombine.high %v166_v3, %v174_v4  ;;  %v189_v10 = vld [vmem:[%s2222_s14 + $0x150] sm:$0xff]  ;;  %v1857_v14 = vcombine.low %v166_v3, %v174_v4 }
  0x1b   : > { %832 = vmatprep.subr.bf16.mxu0 %v1868_v21  ;;  %875 = vmatprep.subr.bf16.mxu1 %v1870_v22  ;;  %v1900_v37 = vcombine.high %v211_v31, %v219_v32  ;;  %v1902_v38 = vcombine.high %v212_v33, %v220_v34  ;;  %v227_v39 = vld [vmem:[%s2222_s14 + $0x280] sm:$0xff]  ;;  %v228_v41 = vld [vmem:[%s2222_s14 + $0x288] sm:$0xff]  ;;  %v1899_v43 = vcombine.low %v211_v31, %v219_v32  ;;  %v182_v11 = vld [vmem:[%s2222_s14 + $0x118] sm:$0xff] }
  0x1c   : > { %v235_v40 = vld [vmem:[%s2222_s14 + $0x2c0] sm:$0xff]  ;;  %v236_v42 = vld [vmem:[%s2222_s14 + $0x2c8] sm:$0xff]  ;;  %v1901_v44 = vcombine.low %v212_v33, %v220_v34  ;;  %v190_v12 = vld [vmem:[%s2222_s14 + $0x158] sm:$0xff]  ;;  %v1872_v15 = vcombine.high %v181_v9, %v189_v10  ;;  %v1871_v21 = vcombine.low %v181_v9, %v189_v10 }
  0x1d   : > { %v1916_v45 = vcombine.high %v227_v39, %v235_v40  ;;  %v1918_v46 = vcombine.high %v228_v41, %v236_v42  ;;  %v243_v47 = vld [vmem:[%s2222_s14 + $0x300] sm:$0xff]  ;;  %v244_v49 = vld [vmem:[%s2222_s14 + $0x308] sm:$0xff]  ;;  %v1915_v51 = vcombine.low %v227_v39, %v235_v40  ;;  %v1917_v52 = vcombine.low %v228_v41, %v236_v42  ;;  %v197_v17 = vld [vmem:[%s2222_s14 + $0x190] sm:$0xff] }
  0x1e   : > { %833 = vmatpush1.bf16.msra.mxu0 %v1867_v27  ;;  %876 = vmatpush1.bf16.msra.mxu1 %v1869_v28  ;;  %v251_v48 = vld [vmem:[%s2222_s14 + $0x340] sm:$0xff]  ;;  %v252_v50 = vld [vmem:[%s2222_s14 + $0x348] sm:$0xff]  ;;  %v1874_v16 = vcombine.high %v182_v11, %v190_v12  ;;  %v205_v18 = vld [vmem:[%s2222_s14 + $0x1d0] sm:$0xff]  ;;  %v1873_v22 = vcombine.low %v182_v11, %v190_v12 }
  0x1f   : > { %834 = vmatprep.subr.bf16.mxu0 %v1884_v29  ;;  %877 = vmatprep.subr.bf16.mxu1 %v1886_v30  ;;  %v1932_v53 = vcombine.high %v243_v47, %v251_v48  ;;  %v1934_v54 = vcombine.high %v244_v49, %v252_v50  ;;  %v1931_v59 = vcombine.low %v243_v47, %v251_v48  ;;  %v2261_v2 = vld [vmem:[%s2433_s1] sm:$0x3f]   ;;  %v198_v19 = vld [vmem:[%s2222_s14 + $0x198] sm:$0xff]  ;;  %v213_v25 = vld [vmem:[%s2222_s14 + $0x210] sm:$0xff] }
  0x20   : > { %v1933_v60 = vcombine.low %v244_v49, %v252_v50  ;;  %v206_v20 = vld [vmem:[%s2222_s14 + $0x1d8] sm:$0xff]  ;;  %v1888_v23 = vcombine.high %v197_v17, %v205_v18  ;;  %v221_v26 = vld [vmem:[%s2222_s14 + $0x250] sm:$0xff]  ;;  %v1887_v29 = vcombine.low %v197_v17, %v205_v18  ;;  %v151_v49 = vld [vmem:[%s2222_s14 + $0x20] sm:$0xff] }
  0x21   : > { %v1890_v24 = vcombine.high %v198_v19, %v206_v20  ;;  %v214_v27 = vld [vmem:[%s2222_s14 + $0x218] sm:$0xff]  ;;  %v1889_v30 = vcombine.low %v198_v19, %v206_v20  ;;  %v1904_v31 = vcombine.high %v213_v25, %v221_v26  ;;  %v229_v33 = vld [vmem:[%s2222_s14 + $0x290] sm:$0xff]  ;;  %v159_v50 = vld [vmem:[%s2222_s14 + $0x60] sm:$0xff] }
  0x22   : > { %835 = vmatpush1.bf16.msra.mxu0 %v1883_v35  ;;  %878 = vmatpush1.bf16.msra.mxu1 %v1885_v36  ;;  %v222_v28 = vld [vmem:[%s2222_s14 + $0x258] sm:$0xff]  ;;  %v237_v34 = vld [vmem:[%s2222_s14 + $0x2d0] sm:$0xff]  ;;  %v1844_v55 = vcombine.high %v151_v49, %v159_v50  ;;  %v167_v57 = vld [vmem:[%s2222_s14 + $0xa0] sm:$0xff] }
  0x23   : > { %836 = vmatprep.subr.bf16.mxu0 %v1900_v37  ;;  %879 = vmatprep.subr.bf16.mxu1 %v1902_v38  ;;  %v1906_v32 = vcombine.high %v214_v27, %v222_v28  ;;  %v230_v35 = vld [vmem:[%s2222_s14 + $0x298] sm:$0xff]  ;;  %v1903_v37 = vcombine.low %v213_v25, %v221_v26  ;;  %v1905_v38 = vcombine.low %v214_v27, %v222_v28  ;;  %v245_v41 = vld [vmem:[%s2222_s14 + $0x310] sm:$0xff]  ;;  %v175_v58 = vld [vmem:[%s2222_s14 + $0xe0] sm:$0xff] }
  0x24   : > { %v238_v36 = vld [vmem:[%s2222_s14 + $0x2d8] sm:$0xff]  ;;  %v1920_v39 = vcombine.high %v229_v33, %v237_v34  ;;  %v253_v42 = vld [vmem:[%s2222_s14 + $0x350] sm:$0xff]  ;;  %v1860_v63 = vcombine.high %v167_v57, %v175_v58  ;;  %v183_v3 = vld [vmem:[%s2222_s14 + $0x120] sm:$0xff] }
  0x25   : > { %v1922_v40 = vcombine.high %v230_v35, %v238_v36  ;;  %v1936_v47 = vcombine.high %v245_v41, %v253_v42  ;;  %v191_v4 = vld [vmem:[%s2222_s14 + $0x160] sm:$0xff] }
  0x26   : > { %837 = vmatpush1.bf16.msra.mxu0 %v1899_v43  ;;  %880 = vmatpush1.bf16.msra.mxu1 %v1901_v44  ;;  %v246_v43 = vld [vmem:[%s2222_s14 + $0x318] sm:$0xff]  ;;  %v1876_v9 = vcombine.high %v183_v3, %v191_v4  ;;  %v199_v11 = vld [vmem:[%s2222_s14 + $0x1a0] sm:$0xff] }
  0x27   : > { %838 = vmatprep.subr.bf16.mxu0 %v1916_v45  ;;  %881 = vmatprep.subr.bf16.mxu1 %v1918_v46  ;;  %v254_v44 = vld [vmem:[%s2222_s14 + $0x358] sm:$0xff]  ;;  %v1919_v45 = vcombine.low %v229_v33, %v237_v34  ;;  %v1921_v46 = vcombine.low %v230_v35, %v238_v36  ;;  %v207_v12 = vld [vmem:[%s2222_s14 + $0x1e0] sm:$0xff] }
  0x28   : > { %v1938_v48 = vcombine.high %v246_v43, %v254_v44  ;;  %v1892_v17 = vcombine.high %v199_v11, %v207_v12  ;;  %v215_v19 = vld [vmem:[%s2222_s14 + $0x220] sm:$0xff] }
  0x29   : > { %v223_v20 = vld [vmem:[%s2222_s14 + $0x260] sm:$0xff] }
  0x2a   : > { %839 = vmatpush1.bf16.msra.mxu0 %v1915_v51  ;;  %882 = vmatpush1.bf16.msra.mxu1 %v1917_v52  ;;  %v152_v51 = vld [vmem:[%s2222_s14 + $0x28] sm:$0xff]  ;;  %v1908_v25 = vcombine.high %v215_v19, %v223_v20  ;;  %v231_v27 = vld [vmem:[%s2222_s14 + $0x2a0] sm:$0xff] }
  0x2b   : > { %840 = vmatprep.subr.bf16.mxu0 %v1932_v53  ;;  %883 = vmatprep.subr.bf16.mxu1 %v1934_v54  ;;  %v160_v52 = vld [vmem:[%s2222_s14 + $0x68] sm:$0xff]  ;;  %v1935_v53 = vcombine.low %v245_v41, %v253_v42  ;;  %v1937_v54 = vcombine.low %v246_v43, %v254_v44  ;;  %v239_v28 = vld [vmem:[%s2222_s14 + $0x2e0] sm:$0xff]  ;;  %v153_v43 = vld [vmem:[%s2222_s14 + $0x30] sm:$0xff] }
  0x2c   : > { %v1846_v56 = vcombine.high %v152_v51, %v160_v52  ;;  %v1924_v33 = vcombine.high %v231_v27, %v239_v28  ;;  %v247_v35 = vld [vmem:[%s2222_s14 + $0x320] sm:$0xff]  ;;  %v161_v44 = vld [vmem:[%s2222_s14 + $0x70] sm:$0xff] }
  0x2d   : > { %v255_v36 = vld [vmem:[%s2222_s14 + $0x360] sm:$0xff] }
  0x2e   : > { %841 = vmatpush1.bf16.msra.mxu0 %v1931_v59  ;;  %884 = vmatpush1.bf16.msra.mxu1 %v1933_v60  ;;  %v168_v59 = vld [vmem:[%s2222_s14 + $0xa8] sm:$0xff]  ;;  %v1940_v41 = vcombine.high %v247_v35, %v255_v36 }
  0x2f   : > { %914 = vmatprep.subr.bf16.mxu0 %v1840_v61  ;;  %957 = vmatprep.subr.bf16.mxu1 %v1842_v62  ;;  %v176_v60 = vld [vmem:[%s2222_s14 + $0xe8] sm:$0xff]  ;;  %v1843_v61 = vcombine.low %v151_v49, %v159_v50  ;;  %v1845_v62 = vcombine.low %v152_v51, %v160_v52  ;;  %v1848_v49 = vcombine.high %v153_v43, %v161_v44  ;;  %v169_v51 = vld [vmem:[%s2222_s14 + $0xb0] sm:$0xff] }
  0x30   : > { %v1862_v1 = vcombine.high %v168_v59, %v176_v60  ;;  %v177_v52 = vld [vmem:[%s2222_s14 + $0xf0] sm:$0xff] }
  0x31   : > { %1947 = vmatmul.mubr.msk.bf16.vlgmr.msra.gmra.mrb[0].mxu0 %vm824_vm0, %v2261_v2  ;;  %1948 = vmatmul.mubr.msk.bf16.vlgmr.msra.gmra.mrb[0].mxu1 %vm824_vm0, %v2261_v2 }
  0x32   : > { %915 = vmatpush1.bf16.msra.mxu0 %v1839_v5  ;;  %958 = vmatpush1.bf16.msra.mxu1 %v1841_v6  ;;  %v184_v5 = vld [vmem:[%s2222_s14 + $0x128] sm:$0xff] }
  0x33   : > { %916 = vmatprep.subr.bf16.mxu0 %v1856_v7  ;;  %959 = vmatprep.subr.bf16.mxu1 %v1858_v8  ;;  %v192_v6 = vld [vmem:[%s2222_s14 + $0x168] sm:$0xff]  ;;  %v1859_v7 = vcombine.low %v167_v57, %v175_v58  ;;  %v1861_v8 = vcombine.low %v168_v59, %v176_v60  ;;  %v1864_v57 = vcombine.high %v169_v51, %v177_v52  ;;  %v185_v59 = vld [vmem:[%s2222_s14 + $0x130] sm:$0xff] }
  0x34   : > { %946 = vmatprep.mubr.bf16.mxu0 %v2190_v0  ;;  %989 = vmatprep.mubr.bf16.mxu1 %v2190_v0  ;;  %v1878_v10 = vcombine.high %v184_v5, %v192_v6  ;;  %v193_v60 = vld [vmem:[%s2222_s14 + $0x170] sm:$0xff] }
  0x36   : > { %917 = vmatpush1.bf16.msra.mxu0 %v1855_v13  ;;  %960 = vmatpush1.bf16.msra.mxu1 %v1857_v14  ;;  %v200_v13 = vld [vmem:[%s2222_s14 + $0x1a8] sm:$0xff] }
  0x37   : > { %918 = vmatprep.subr.bf16.mxu0 %v1872_v15  ;;  %961 = vmatprep.subr.bf16.mxu1 %v1874_v16  ;;  %v208_v14 = vld [vmem:[%s2222_s14 + $0x1e8] sm:$0xff]  ;;  %v1875_v15 = vcombine.low %v183_v3, %v191_v4  ;;  %v1877_v16 = vcombine.low %v184_v5, %v192_v6  ;;  %v1880_v3 = vcombine.high %v185_v59, %v193_v60  ;;  %v201_v5 = vld [vmem:[%s2222_s14 + $0x1b0] sm:$0xff] }
  0x38   : > { %v1894_v18 = vcombine.high %v200_v13, %v208_v14  ;;  %v209_v6 = vld [vmem:[%s2222_s14 + $0x1f0] sm:$0xff] }
  0x3a   : > { %919 = vmatpush1.bf16.msra.mxu0 %v1871_v21  ;;  %962 = vmatpush1.bf16.msra.mxu1 %v1873_v22  ;;  %v216_v21 = vld [vmem:[%s2222_s14 + $0x228] sm:$0xff] }
  0x3b   : > { %920 = vmatprep.subr.bf16.mxu0 %v1888_v23  ;;  %963 = vmatprep.subr.bf16.mxu1 %v1890_v24  ;;  %v224_v22 = vld [vmem:[%s2222_s14 + $0x268] sm:$0xff]  ;;  %v1891_v23 = vcombine.low %v199_v11, %v207_v12  ;;  %v1893_v24 = vcombine.low %v200_v13, %v208_v14  ;;  %v1896_v11 = vcombine.high %v201_v5, %v209_v6  ;;  %v217_v13 = vld [vmem:[%s2222_s14 + $0x230] sm:$0xff] }
  0x3c   : > { %v1910_v26 = vcombine.high %v216_v21, %v224_v22  ;;  %v225_v14 = vld [vmem:[%s2222_s14 + $0x270] sm:$0xff] }
  0x3e   : > { %921 = vmatpush1.bf16.msra.mxu0 %v1887_v29  ;;  %964 = vmatpush1.bf16.msra.mxu1 %v1889_v30  ;;  %v232_v29 = vld [vmem:[%s2222_s14 + $0x2a8] sm:$0xff] }
  0x3f   : > { %922 = vmatprep.subr.bf16.mxu0 %v1904_v31  ;;  %965 = vmatprep.subr.bf16.mxu1 %v1906_v32  ;;  %v240_v30 = vld [vmem:[%s2222_s14 + $0x2e8] sm:$0xff]  ;;  %v1907_v31 = vcombine.low %v215_v19, %v223_v20  ;;  %v1909_v32 = vcombine.low %v216_v21, %v224_v22  ;;  %v233_v20 = vld [vmem:[%s2222_s14 + $0x2b0] sm:$0xff]  ;;  %v234_v22 = vld [vmem:[%s2222_s14 + $0x2b8] sm:$0xff] }
  0x40   : > { %v1926_v34 = vcombine.high %v232_v29, %v240_v30  ;;  %v241_v21 = vld [vmem:[%s2222_s14 + $0x2f0] sm:$0xff] }
  0x42   : > { %923 = vmatpush1.bf16.msra.mxu0 %v1903_v37  ;;  %966 = vmatpush1.bf16.msra.mxu1 %v1905_v38  ;;  %v248_v37 = vld [vmem:[%s2222_s14 + $0x328] sm:$0xff] }
  0x43   : > { %924 = vmatprep.subr.bf16.mxu0 %v1920_v39  ;;  %967 = vmatprep.subr.bf16.mxu1 %v1922_v40  ;;  %v256_v38 = vld [vmem:[%s2222_s14 + $0x368] sm:$0xff]  ;;  %v1923_v39 = vcombine.low %v231_v27, %v239_v28  ;;  %v1925_v40 = vcombine.low %v232_v29, %v240_v30  ;;  %v249_v28 = vld [vmem:[%s2222_s14 + $0x330] sm:$0xff]  ;;  %v250_v30 = vld [vmem:[%s2222_s14 + $0x338] sm:$0xff] }
  0x44   : > { %v1942_v42 = vcombine.high %v248_v37, %v256_v38  ;;  %v257_v29 = vld [vmem:[%s2222_s14 + $0x370] sm:$0xff] }
  0x46   : > { %925 = vmatpush1.bf16.msra.mxu0 %v1919_v45  ;;  %968 = vmatpush1.bf16.msra.mxu1 %v1921_v46  ;;  %v154_v45 = vld [vmem:[%s2222_s14 + $0x38] sm:$0xff] }
  0x47   : > { %926 = vmatprep.subr.bf16.mxu0 %v1936_v47  ;;  %969 = vmatprep.subr.bf16.mxu1 %v1938_v48  ;;  %v162_v46 = vld [vmem:[%s2222_s14 + $0x78] sm:$0xff]  ;;  %v1939_v47 = vcombine.low %v247_v35, %v255_v36  ;;  %v1941_v48 = vcombine.low %v248_v37, %v256_v38  ;;  %v1943_v36 = vcombine.low %v249_v28, %v257_v29 }
  0x48   : > { %v1850_v50 = vcombine.high %v154_v45, %v162_v46 }
  0x4a   : > { %927 = vmatpush1.bf16.msra.mxu0 %v1935_v53  ;;  %970 = vmatpush1.bf16.msra.mxu1 %v1937_v54  ;;  %v170_v53 = vld [vmem:[%s2222_s14 + $0xb8] sm:$0xff] }
  0x4b   : > { %1000 = vmatprep.subr.bf16.mxu0 %v1844_v55  ;;  %1043 = vmatprep.subr.bf16.mxu1 %v1846_v56  ;;  %v178_v54 = vld [vmem:[%s2222_s14 + $0xf8] sm:$0xff]  ;;  %v1847_v55 = vcombine.low %v153_v43, %v161_v44  ;;  %v1849_v56 = vcombine.low %v154_v45, %v162_v46 }
  0x4c   : > { %v1866_v58 = vcombine.high %v170_v53, %v178_v54 }
  0x4d   : > { %1949 = vmatmul.mubr.msk.bf16.vlgmr.msra.gmra.mrb[4].mxu0 %vm824_vm0, %v2261_v2  ;;  %1950 = vmatmul.mubr.msk.bf16.vlgmr.msra.gmra.mrb[4].mxu1 %vm824_vm0, %v2261_v2 }
  0x4e   : > { %1001 = vmatpush1.bf16.msra.mxu0 %v1843_v61  ;;  %1044 = vmatpush1.bf16.msra.mxu1 %v1845_v62  ;;  %v186_v61 = vld [vmem:[%s2222_s14 + $0x138] sm:$0xff] }
  0x4f   : > { %1002 = vmatprep.subr.bf16.mxu0 %v1860_v63  ;;  %1045 = vmatprep.subr.bf16.mxu1 %v1862_v1  ;;  %v194_v62 = vld [vmem:[%s2222_s14 + $0x178] sm:$0xff]  ;;  %v1863_v63 = vcombine.low %v169_v51, %v177_v52  ;;  %v1865_v1 = vcombine.low %v170_v53, %v178_v54 }
  0x50   : > { %1032 = vmatprep.mubr.bf16.mxu0 %v2190_v0  ;;  %1075 = vmatprep.mubr.bf16.mxu1 %v2190_v0  ;;  %v1882_v4 = vcombine.high %v186_v61, %v194_v62 }
  0x52   : > { %1003 = vmatpush1.bf16.msra.mxu0 %v1859_v7  ;;  %1046 = vmatpush1.bf16.msra.mxu1 %v1861_v8  ;;  %v202_v7 = vld [vmem:[%s2222_s14 + $0x1b8] sm:$0xff] }
  0x53   : > { %1004 = vmatprep.subr.bf16.mxu0 %v1876_v9  ;;  %1047 = vmatprep.subr.bf16.mxu1 %v1878_v10  ;;  %v210_v8 = vld [vmem:[%s2222_s14 + $0x1f8] sm:$0xff]  ;;  %v1879_v9 = vcombine.low %v185_v59, %v193_v60  ;;  %v1881_v10 = vcombine.low %v186_v61, %v194_v62 }
  0x54   : > { %v1898_v12 = vcombine.high %v202_v7, %v210_v8 }
  0x56   : > { %1005 = vmatpush1.bf16.msra.mxu0 %v1875_v15  ;;  %1048 = vmatpush1.bf16.msra.mxu1 %v1877_v16  ;;  %v218_v15 = vld [vmem:[%s2222_s14 + $0x238] sm:$0xff] }
  0x57   : > { %1006 = vmatprep.subr.bf16.mxu0 %v1892_v17  ;;  %1049 = vmatprep.subr.bf16.mxu1 %v1894_v18  ;;  %v226_v16 = vld [vmem:[%s2222_s14 + $0x278] sm:$0xff]  ;;  %v1895_v17 = vcombine.low %v201_v5, %v209_v6  ;;  %v1912_v18 = vcombine.high %v217_v13, %v225_v14 }
  0x58   : > { %v1914_v19 = vcombine.high %v218_v15, %v226_v16 }
  0x5a   : > { %1007 = vmatpush1.bf16.msra.mxu0 %v1891_v23  ;;  %1050 = vmatpush1.bf16.msra.mxu1 %v1893_v24  ;;  %v242_v23 = vld [vmem:[%s2222_s14 + $0x2f8] sm:$0xff]  ;;  %v1911_v24 = vcombine.low %v217_v13, %v225_v14 }
  0x5b   : > { %1008 = vmatprep.subr.bf16.mxu0 %v1908_v25  ;;  %1051 = vmatprep.subr.bf16.mxu1 %v1910_v26  ;;  %v1913_v25 = vcombine.low %v218_v15, %v226_v16  ;;  %v1928_v26 = vcombine.high %v233_v20, %v241_v21  ;;  %v1930_v27 = vcombine.high %v234_v22, %v242_v23 }
  0x5e   : > { %1009 = vmatpush1.bf16.msra.mxu0 %v1907_v31  ;;  %1052 = vmatpush1.bf16.msra.mxu1 %v1909_v32  ;;  %v258_v31 = vld [vmem:[%s2222_s14 + $0x378] sm:$0xff]  ;;  %v1927_v32 = vcombine.low %v233_v20, %v241_v21 }
  0x5f   : > { %1010 = vmatprep.subr.bf16.mxu0 %v1924_v33  ;;  %1053 = vmatprep.subr.bf16.mxu1 %v1926_v34  ;;  %v1929_v33 = vcombine.low %v234_v22, %v242_v23  ;;  %v1944_v34 = vcombine.high %v249_v28, %v257_v29  ;;  %v1946_v35 = vcombine.high %v250_v30, %v258_v31 }
  0x60   : > { %v1945_v37 = vcombine.low %v250_v30, %v258_v31 }
  0x62   : > { %1011 = vmatpush1.bf16.msra.mxu0 %v1923_v39  ;;  %1054 = vmatpush1.bf16.msra.mxu1 %v1925_v40 }
  0x63   : > { %1012 = vmatprep.subr.bf16.mxu0 %v1940_v41  ;;  %1055 = vmatprep.subr.bf16.mxu1 %v1942_v42 }
  0x66   : > { %1013 = vmatpush1.bf16.msra.mxu0 %v1939_v47  ;;  %1056 = vmatpush1.bf16.msra.mxu1 %v1941_v48 }
  0x67   : > { %1086 = vmatprep.subr.bf16.mxu0 %v1848_v49  ;;  %1129 = vmatprep.subr.bf16.mxu1 %v1850_v50 }
  0x69   : > { %1951 = vmatmul.mubr.msk.bf16.vlgmr.msra.gmra.mrb[8].mxu0 %vm824_vm0, %v2261_v2  ;;  %1952 = vmatmul.mubr.msk.bf16.vlgmr.msra.gmra.mrb[8].mxu1 %vm824_vm0, %v2261_v2 }
  0x6a   : > { %1087 = vmatpush1.bf16.msra.mxu0 %v1847_v55  ;;  %1130 = vmatpush1.bf16.msra.mxu1 %v1849_v56 }
  0x6b   : > { %1088 = vmatprep.subr.bf16.mxu0 %v1864_v57  ;;  %1131 = vmatprep.subr.bf16.mxu1 %v1866_v58 }
  0x6c   : > { %1118 = vmatprep.mubr.bf16.mxu0 %v2190_v0  ;;  %1161 = vmatprep.mubr.bf16.mxu1 %v2190_v0  ;;  %v1897_v0 = vcombine.low %v202_v7, %v210_v8 }
  0x6e   : > { %1089 = vmatpush1.bf16.msra.mxu0 %v1863_v63  ;;  %1132 = vmatpush1.bf16.msra.mxu1 %v1865_v1 }
  0x6f   : > { %1090 = vmatprep.subr.bf16.mxu0 %v1880_v3  ;;  %1133 = vmatprep.subr.bf16.mxu1 %v1882_v4 }
  0x72   : > { %1091 = vmatpush1.bf16.msra.mxu0 %v1879_v9  ;;  %1134 = vmatpush1.bf16.msra.mxu1 %v1881_v10 }
  0x73   : > { %1092 = vmatprep.subr.bf16.mxu0 %v1896_v11  ;;  %1135 = vmatprep.subr.bf16.mxu1 %v1898_v12 }
  0x76   : > { %1093 = vmatpush1.bf16.msra.mxu0 %v1895_v17  ;;  %1136 = vmatpush1.bf16.msra.mxu1 %v1897_v0 }
  0x77   : > { %1094 = vmatprep.subr.bf16.mxu0 %v1912_v18  ;;  %1137 = vmatprep.subr.bf16.mxu1 %v1914_v19 }
  0x7a   : > { %1095 = vmatpush1.bf16.msra.mxu0 %v1911_v24  ;;  %1138 = vmatpush1.bf16.msra.mxu1 %v1913_v25 }
  0x7b   : > { %1096 = vmatprep.subr.bf16.mxu0 %v1928_v26  ;;  %1139 = vmatprep.subr.bf16.mxu1 %v1930_v27 }
  0x7e   : > { %1097 = vmatpush1.bf16.msra.mxu0 %v1927_v32  ;;  %1140 = vmatpush1.bf16.msra.mxu1 %v1929_v33 }
  0x7f   : > { %1098 = vmatprep.subr.bf16.mxu0 %v1944_v34  ;;  %1141 = vmatprep.subr.bf16.mxu1 %v1946_v35 }
  0x82   : > { %1099 = vmatpush1.bf16.msra.mxu0 %v1943_v36  ;;  %1142 = vmatpush1.bf16.msra.mxu1 %v1945_v37 }
  0x85   : > { %1953 = vmatmul.mubr.msk.bf16.vlgmr.msra.gmra.mrb[12].mxu0 %vm824_vm0, %v2261_v2  ;;  %1954 = vmatmul.mubr.msk.bf16.vlgmr.msra.gmra.mrb[12].mxu1 %vm824_vm0, %v2261_v2 }
 0x104   : > { %v862_v38 = vpop.f32.mrb[0].mxu0  ;;  %v905_v40 = vpop.f32.mrb[0].mxu1 }
 0x105   : > { %2022 = vtanh.f32 %v862_v38  ;;  %v1955_v39 = vmul.f32 -1.442695, %v862_v38  ;;  %v864_v41 = vpop.f32.mrb[1].mxu0  ;;  %v1957_v42 = vmul.f32 -1.442695, %v905_v40  ;;  %v907_v44 = vpop.f32.mrb[1].mxu1 }
 0x106   : > { %2024 = vtanh.f32 %v905_v40  ;;  %v1956_v43 = vmul.f32 -1.442695, %v864_v41  ;;  %v866_v45 = vpop.f32.mrb[2].mxu0  ;;  %v909_v46 = vpop.f32.mrb[2].mxu1  ;;  %v1958_v48 = vmul.f32 -1.442695, %v907_v44 }
 0x107   : > { %2026 = vpow2.f32 %v1955_v39  ;;  %v868_v47 = vpop.f32.mrb[3].mxu0  ;;  %v911_v49 = vpop.f32.mrb[3].mxu1  ;;  %v1971_v50 = vmul.f32 -1.442695, %v866_v45  ;;  %v1973_v2 = vmul.f32 -1.442695, %v909_v46 }
 0x108   : > { %2028 = vpow2.f32 %v1957_v42  ;;  %v1972_v51 = vmul.f32 -1.442695, %v868_v47  ;;  %v1974_v52 = vmul.f32 -1.442695, %v911_v49 }
 0x109   : > { %2030 = vtanh.f32 %v864_v41 }
 0x10a   : > { %2032 = vpow2.f32 %v1956_v43 }
 0x10b   : > { %2034 = vtanh.f32 %v907_v44 }
 0x10c   : > { %2036 = vpow2.f32 %v1958_v48 }
 0x10d   : > { %2038 = vpow2.f32 %v1971_v50 }
 0x10e   : > { %2040 = vpow2.f32 %v1973_v2 }
 0x10f   : > { %v2023_v53 = vpop.eup %2022  ;;  %2042 = vpow2.f32 %v1972_v51 }
 0x110   : > { %v2025_v54 = vpop.eup %2024  ;;  %1188 = vst [vmem:[#allocation2] sm:$0xf] %v2023_v53  ;;  %2044 = vpow2.f32 %v1974_v52 }
 0x111   : > { %v2027_v55 = vpop.eup %2026  ;;  %1190 = vst [vmem:[#allocation2 + $0x10] sm:$0xf] %v2025_v54 }
 0x112   : > { %v2029_v56 = vpop.eup %2028  ;;  %v1300_v57 = vadd.f32 1.0, %v2027_v55 }
 0x113   : > { %v2031_v58 = vpop.eup %2030  ;;  %v1302_v59 = vadd.f32 1.0, %v2029_v56 }
 0x114   : > { %v2033_v60 = vpop.eup %2032  ;;  %2046 = vrcp.f32 %v1300_v57  ;;  %1189 = vst [vmem:[#allocation2 + $0x8] sm:$0xf] %v2031_v58 }
 0x115   : > { %v2035_v61 = vpop.eup %2034  ;;  %2048 = vrcp.f32 %v1302_v59  ;;  %v1301_v62 = vadd.f32 1.0, %v2033_v60 }
 0x116   : > { %v2037_v63 = vpop.eup %2036  ;;  %1191 = vst [vmem:[#allocation2 + $0x18] sm:$0xf] %v2035_v61 }
 0x117   : > { %v2039_v1 = vpop.eup %2038  ;;  %2050 = vrcp.f32 %v1301_v62  ;;  %v1303_v3 = vadd.f32 1.0, %v2037_v63 }
 0x118   : > { %v2041_v4 = vpop.eup %2040  ;;  %v1316_v5 = vadd.f32 1.0, %v2039_v1 }
 0x119   : > { %v2043_v6 = vpop.eup %2042  ;;  %2052 = vrcp.f32 %v1303_v3  ;;  %v1318_v7 = vadd.f32 1.0, %v2041_v4 }
 0x11a   : > { %v2045_v8 = vpop.eup %2044  ;;  %2054 = vrcp.f32 %v1316_v5  ;;  %v1317_v9 = vadd.f32 1.0, %v2043_v6 }
 0x11b   : > { %2056 = vrcp.f32 %v1318_v7  ;;  %v1319_v10 = vadd.f32 1.0, %v2045_v8 }
 0x11c   : > { %2058 = vrcp.f32 %v1317_v9 }
 0x11d   : > { %2060 = vrcp.f32 %v1319_v10 }
 0x11e   : > { %v2047_v11 = vpop.eup %2046 }
 0x11f   : > { %v2049_v12 = vpop.eup %2048  ;;  %1396 = vst [vmem:[#allocation2] sm:$0xf0] %v2047_v11 }
 0x120   : > { %1398 = vst [vmem:[#allocation2 + $0x10] sm:$0xf0] %v2049_v12  ;;  %v948_v13 = vpop.f32.mrb[4].mxu0  ;;  %v991_v16 = vpop.f32.mrb[4].mxu1 }
 0x121   : > { %v2051_v14 = vpop.eup %2050  ;;  %2062 = vtanh.f32 %v948_v13  ;;  %v1959_v15 = vmul.f32 -1.442695, %v948_v13  ;;  %v950_v17 = vpop.f32.mrb[5].mxu0  ;;  %v1961_v0 = vmul.f32 -1.442695, %v991_v16 }
 0x122   : > { %1397 = vst [vmem:[#allocation2 + $0x8] sm:$0xf0] %v2051_v14  ;;  %2064 = vtanh.f32 %v991_v16  ;;  %v1960_v18 = vmul.f32 -1.442695, %v950_v17  ;;  %v993_v19 = vpop.f32.mrb[5].mxu1  ;;  %v952_v20 = vpop.f32.mrb[6].mxu0 }
 0x123   : > { %v2053_v21 = vpop.eup %2052  ;;  %2066 = vpow2.f32 %v1959_v15  ;;  %v995_v22 = vpop.f32.mrb[6].mxu1  ;;  %v1962_v25 = vmul.f32 -1.442695, %v993_v19  ;;  %v1975_v28 = vmul.f32 -1.442695, %v952_v20 }
 0x124   : > { %v954_v23 = vpop.f32.mrb[7].mxu0  ;;  %v2055_v24 = vpop.eup %2054  ;;  %1399 = vst [vmem:[#allocation2 + $0x18] sm:$0xf0] %v2053_v21  ;;  %2068 = vpow2.f32 %v1961_v0  ;;  %v1977_v30 = vmul.f32 -1.442695, %v995_v22 }
 0x125   : > { %v997_v26 = vpop.f32.mrb[7].mxu1  ;;  %v2057_v27 = vpop.eup %2056  ;;  %1412 = vst [vmem:[#allocation2 + $0x80] sm:$0xf] %v2055_v24  ;;  %2070 = vtanh.f32 %v950_v17  ;;  %v1976_v32 = vmul.f32 -1.442695, %v954_v23 }
 0x126   : > { %v2059_v29 = vpop.eup %2058  ;;  %1414 = vst [vmem:[#allocation2 + $0x90] sm:$0xf] %v2057_v27  ;;  %2072 = vpow2.f32 %v1960_v18  ;;  %v1978_v33 = vmul.f32 -1.442695, %v997_v26 }
 0x127   : > { %v2061_v31 = vpop.eup %2060  ;;  %1413 = vst [vmem:[#allocation2 + $0x88] sm:$0xf] %v2059_v29  ;;  %2074 = vtanh.f32 %v993_v19 }
 0x128   : > { %1415 = vst [vmem:[#allocation2 + $0x98] sm:$0xf] %v2061_v31  ;;  %2076 = vpow2.f32 %v1962_v25 }
 0x129   : > { %2078 = vpow2.f32 %v1975_v28 }
 0x12a   : > { %2080 = vpow2.f32 %v1977_v30  ;;  %v1430_v30 = vld [vmem:[#allocation2] sm:$0xf0] }
 0x12b   : > { %v2063_v34 = vpop.eup %2062  ;;  %2082 = vpow2.f32 %v1976_v32 }
 0x12c   : > { %v2065_v35 = vpop.eup %2064  ;;  %1192 = vst [vmem:[#allocation2 + $0x20] sm:$0xf] %v2063_v34  ;;  %2084 = vpow2.f32 %v1978_v33  ;;  %v1431_v33 = vld [vmem:[#allocation2 + $0x8] sm:$0xf0] }
 0x12d   : > { %v2067_v36 = vpop.eup %2066  ;;  %1194 = vst [vmem:[#allocation2 + $0x30] sm:$0xf] %v2065_v35  ;;  %v1428_v35 = vld [vmem:[#allocation2] sm:$0xf] }
 0x12e   : > { %v2069_v37 = vpop.eup %2068  ;;  %v1304_v38 = vadd.f32 1.0, %v2067_v36 }
 0x12f   : > { %v2071_v39 = vpop.eup %2070  ;;  %v1306_v40 = vadd.f32 1.0, %v2069_v37  ;;  %v1434_v37 = vsub.f32 1.0, %v1430_v30 }
 0x130   : > { %v2073_v41 = vpop.eup %2072  ;;  %1193 = vst [vmem:[#allocation2 + $0x28] sm:$0xf] %v2071_v39  ;;  %2086 = vrcp.f32 %v1304_v38  ;;  %v1429_v38 = vld [vmem:[#allocation2 + $0x8] sm:$0xf]  ;;  %v1435_v39 = vsub.f32 1.0, %v1431_v33 }
 0x131   : > { %v2075_v42 = vpop.eup %2074  ;;  %v1305_v43 = vadd.f32 1.0, %v2073_v41  ;;  %2088 = vrcp.f32 %v1306_v40  ;;  %v1438_v40 = vrot.slane %v1428_v35, 4 }
 0x132   : > { %v2077_v44 = vpop.eup %2076  ;;  %1195 = vst [vmem:[#allocation2 + $0x38] sm:$0xf] %v2075_v42  ;;  %v1439_v42 = vrot.slane %v1429_v38, 4 }
 0x133   : > { %v2079_v45 = vpop.eup %2078  ;;  %2090 = vrcp.f32 %v1305_v43  ;;  %v1307_v46 = vadd.f32 1.0, %v2077_v44  ;;  %v1432_v44 = vmul.f32 0.0, %v1430_v30 }
 0x134   : > { %v2081_v47 = vpop.eup %2080  ;;  %v1320_v48 = vadd.f32 1.0, %v2079_v45  ;;  %v1442_v45 = vmul.f32 %v1438_v40, %v1434_v37 }
 0x135   : > { %v2083_v49 = vpop.eup %2082  ;;  %2092 = vrcp.f32 %v1307_v46  ;;  %v1322_v50 = vadd.f32 1.0, %v2081_v47 }
 0x136   : > { %v2085_v2 = vpop.eup %2084  ;;  %2094 = vrcp.f32 %v1320_v48  ;;  %v1321_v51 = vadd.f32 1.0, %v2083_v49  ;;  %v1433_v48 = vmul.f32 0.0, %v1431_v33  ;;  %v1443_v49 = vmul.f32 %v1439_v42, %v1435_v39 }
 0x137   : > { %2096 = vrcp.f32 %v1322_v50  ;;  %v1323_v52 = vadd.f32 1.0, %v2085_v2 }
 0x138   : > { %2098 = vrcp.f32 %v1321_v51 }
 0x139   : > { %2100 = vrcp.f32 %v1323_v52 }
 0x13a   : > { %v2087_v53 = vpop.eup %2086 }
 0x13b   : > { %v2089_v54 = vpop.eup %2088  ;;  %1400 = vst [vmem:[#allocation2 + $0x20] sm:$0xf0] %v2087_v53 }
 0x13c   : > { %v1034_v55 = vpop.f32.mrb[8].mxu0  ;;  %1402 = vst [vmem:[#allocation2 + $0x30] sm:$0xf0] %v2089_v54  ;;  %v1077_v58 = vpop.f32.mrb[8].mxu1 }
 0x13d   : > { %v2091_v56 = vpop.eup %2090  ;;  %2102 = vtanh.f32 %v1034_v55  ;;  %v1963_v57 = vmul.f32 -1.442695, %v1034_v55  ;;  %v1036_v59 = vpop.f32.mrb[9].mxu0  ;;  %v1965_v60 = vmul.f32 -1.442695, %v1077_v58 }
 0x13e   : > { %1401 = vst [vmem:[#allocation2 + $0x28] sm:$0xf0] %v2091_v56  ;;  %2104 = vtanh.f32 %v1077_v58  ;;  %v1964_v61 = vmul.f32 -1.442695, %v1036_v59  ;;  %v1079_v62 = vpop.f32.mrb[9].mxu1  ;;  %v1038_v63 = vpop.f32.mrb[10].mxu0 }
 0x13f   : > { %v2093_v1 = vpop.eup %2092  ;;  %2106 = vpow2.f32 %v1963_v57  ;;  %v1081_v3 = vpop.f32.mrb[10].mxu1  ;;  %v1966_v6 = vmul.f32 -1.442695, %v1079_v62  ;;  %v1979_v9 = vmul.f32 -1.442695, %v1038_v63 }
 0x140   : > { %v1040_v4 = vpop.f32.mrb[11].mxu0  ;;  %v2095_v5 = vpop.eup %2094  ;;  %1403 = vst [vmem:[#allocation2 + $0x38] sm:$0xf0] %v2093_v1  ;;  %2108 = vpow2.f32 %v1965_v60  ;;  %v1981_v11 = vmul.f32 -1.442695, %v1081_v3 }
 0x141   : > { %v1083_v7 = vpop.f32.mrb[11].mxu1  ;;  %v2097_v8 = vpop.eup %2096  ;;  %1416 = vst [vmem:[#allocation2 + $0xa0] sm:$0xf] %v2095_v5  ;;  %2110 = vtanh.f32 %v1036_v59  ;;  %v1980_v13 = vmul.f32 -1.442695, %v1040_v4  ;;  %v2365_v5 = vadd.f32 %v1443_v49, %v1433_v48 }
 0x142   : > { %v2099_v10 = vpop.eup %2098  ;;  %1418 = vst [vmem:[#allocation2 + $0xb0] sm:$0xf] %v2097_v8  ;;  %2112 = vpow2.f32 %v1964_v61  ;;  %v1982_v14 = vmul.f32 -1.442695, %v1083_v7  ;;  %v1451_v57 = vld [vmem:[#allocation2 + $0x10] sm:$0xf] }
 0x143   : > { %v2101_v12 = vpop.eup %2100  ;;  %1417 = vst [vmem:[#allocation2 + $0xa8] sm:$0xf] %v2099_v10  ;;  %2114 = vtanh.f32 %v1079_v62  ;;  %v1453_v58 = vld [vmem:[#allocation2 + $0x10] sm:$0xf0]  ;;  %v2363_v62 = vadd.f32 %v1442_v45, %v1432_v44  ;;  %v1454_v63 = vld [vmem:[#allocation2 + $0x18] sm:$0xf0] }
 0x144   : > { %1419 = vst [vmem:[#allocation2 + $0xb8] sm:$0xf] %v2101_v12  ;;  %2116 = vpow2.f32 %v1966_v6  ;;  %v1452_v6 = vld [vmem:[#allocation2 + $0x18] sm:$0xf]  ;;  %v1477_v7 = vld [vmem:[#allocation2 + $0x20] sm:$0xf0] }
 0x145   : > { %2118 = vpow2.f32 %v1979_v9  ;;  %v1457_v10 = vsub.f32 1.0, %v1453_v58  ;;  %v1501_v38 = vld [vmem:[#allocation2 + $0x30] sm:$0xf0]  ;;  %v1499_v44 = vld [vmem:[#allocation2 + $0x30] sm:$0xf] }
 0x146   : > { %2120 = vpow2.f32 %v1981_v11  ;;  %v1478_v11 = vld [vmem:[#allocation2 + $0x28] sm:$0xf0]  ;;  %v1500_v48 = vld [vmem:[#allocation2 + $0x38] sm:$0xf] }
 0x147   : > { %v2103_v15 = vpop.eup %2102  ;;  %2122 = vpow2.f32 %v1980_v13  ;;  %v1502_v45 = vld [vmem:[#allocation2 + $0x38] sm:$0xf0] }
 0x148   : > { %v2105_v16 = vpop.eup %2104  ;;  %1196 = vst [vmem:[#allocation2 + $0x40] sm:$0xf] %v2103_v15  ;;  %2124 = vpow2.f32 %v1982_v14  ;;  %v1461_v14 = vrot.slane %v1451_v57, 4  ;;  %v1458_v15 = vsub.f32 1.0, %v1454_v63 }
 0x149   : > { %v2107_v17 = vpop.eup %2106  ;;  %1198 = vst [vmem:[#allocation2 + $0x50] sm:$0xf] %v2105_v16  ;;  %v1475_v16 = vld [vmem:[#allocation2 + $0x20] sm:$0xf] }
 0x14a   : > { %v2109_v0 = vpop.eup %2108  ;;  %v1308_v19 = vadd.f32 1.0, %v2107_v17 }
 0x14b   : > { %v2111_v18 = vpop.eup %2110  ;;  %v1310_v20 = vadd.f32 1.0, %v2109_v0  ;;  %v1455_v0 = vmul.f32 %v1453_v58, %v2363_v62 }
 0x14c   : > { %v2113_v21 = vpop.eup %2112  ;;  %1197 = vst [vmem:[#allocation2 + $0x48] sm:$0xf] %v2111_v18  ;;  %2126 = vrcp.f32 %v1308_v19  ;;  %v1481_v18 = vsub.f32 1.0, %v1477_v7  ;;  %v1476_v19 = vld [vmem:[#allocation2 + $0x28] sm:$0xf] }
 0x14d   : > { %v2115_v22 = vpop.eup %2114  ;;  %v1309_v23 = vadd.f32 1.0, %v2113_v21  ;;  %2128 = vrcp.f32 %v1310_v20  ;;  %v1456_v21 = vmul.f32 %v1454_v63, %v2365_v5 }
 0x14e   : > { %v2117_v24 = vpop.eup %2116  ;;  %1199 = vst [vmem:[#allocation2 + $0x58] sm:$0xf] %v2115_v22  ;;  %v1462_v22 = vrot.slane %v1452_v6, 4 }
 0x14f   : > { %v2119_v25 = vpop.eup %2118  ;;  %2130 = vrcp.f32 %v1309_v23  ;;  %v1311_v26 = vadd.f32 1.0, %v2117_v24  ;;  %v1482_v23 = vsub.f32 1.0, %v1478_v11  ;;  %v1465_v24 = vmul.f32 %v1461_v14, %v1457_v10 }
 0x150   : > { %v2121_v27 = vpop.eup %2120  ;;  %v1324_v28 = vadd.f32 1.0, %v2119_v25  ;;  %v1485_v25 = vrot.slane %v1475_v16, 4 }
 0x151   : > { %v2123_v29 = vpop.eup %2122  ;;  %2132 = vrcp.f32 %v1311_v26  ;;  %v1326_v31 = vadd.f32 1.0, %v2121_v27  ;;  %v1466_v27 = vmul.f32 %v1462_v22, %v1458_v15  ;;  %v2369_v30 = vadd.f32 %v1465_v24, %v1455_v0 }
 0x152   : > { %v2125_v32 = vpop.eup %2124  ;;  %2134 = vrcp.f32 %v1324_v28  ;;  %v1325_v34 = vadd.f32 1.0, %v2123_v29  ;;  %v1486_v28 = vrot.slane %v1476_v19, 4 }
 0x153   : > { %2136 = vrcp.f32 %v1326_v31  ;;  %v1327_v36 = vadd.f32 1.0, %v2125_v32  ;;  %v1489_v31 = vmul.f32 %v1485_v25, %v1481_v18  ;;  %v2371_v33 = vadd.f32 %v1466_v27, %v1456_v21  ;;  %v1524_v63 = vld [vmem:[#allocation2 + $0x48] sm:$0xf] }
 0x154   : > { %2138 = vrcp.f32 %v1325_v34  ;;  %v1490_v34 = vmul.f32 %v1486_v28, %v1482_v23 }
 0x155   : > { %2140 = vrcp.f32 %v1327_v36  ;;  %v1479_v36 = vmul.f32 %v1477_v7, %v2369_v30  ;;  %v1480_v39 = vmul.f32 %v1478_v11, %v2371_v33 }
 0x156   : > { %v2127_v41 = vpop.eup %2126 }
 0x157   : > { %v2129_v43 = vpop.eup %2128  ;;  %1404 = vst [vmem:[#allocation2 + $0x40] sm:$0xf0] %v2127_v41 }
 0x158   : > { %v1120_v46 = vpop.f32.mrb[12].mxu0  ;;  %1406 = vst [vmem:[#allocation2 + $0x50] sm:$0xf0] %v2129_v43  ;;  %v1163_v2 = vpop.f32.mrb[12].mxu1  ;;  %v2375_v43 = vadd.f32 %v1489_v31, %v1479_v36 }
 0x159   : > { %v2131_v47 = vpop.eup %2130  ;;  %2142 = vtanh.f32 %v1120_v46  ;;  %v1967_v50 = vmul.f32 -1.442695, %v1120_v46  ;;  %v1122_v51 = vpop.f32.mrb[13].mxu0  ;;  %v1969_v52 = vmul.f32 -1.442695, %v1163_v2 }
 0x15a   : > { %1405 = vst [vmem:[#allocation2 + $0x48] sm:$0xf0] %v2131_v47  ;;  %2144 = vtanh.f32 %v1163_v2  ;;  %v1968_v53 = vmul.f32 -1.442695, %v1122_v51  ;;  %v1165_v54 = vpop.f32.mrb[13].mxu1  ;;  %v1124_v55 = vpop.f32.mrb[14].mxu0  ;;  %v2377_v47 = vadd.f32 %v1490_v34, %v1480_v39 }
 0x15b   : > { %v2133_v56 = vpop.eup %2132  ;;  %2146 = vpow2.f32 %v1967_v50  ;;  %v1167_v59 = vpop.f32.mrb[14].mxu1  ;;  %v1970_v1 = vmul.f32 -1.442695, %v1165_v54  ;;  %v1983_v8 = vmul.f32 -1.442695, %v1124_v55  ;;  %v1506_v55 = vsub.f32 1.0, %v1502_v45 }
 0x15c   : > { %v1126_v60 = vpop.f32.mrb[15].mxu0  ;;  %v2135_v61 = vpop.eup %2134  ;;  %1407 = vst [vmem:[#allocation2 + $0x58] sm:$0xf0] %v2133_v56  ;;  %2148 = vpow2.f32 %v1969_v52  ;;  %v1985_v12 = vmul.f32 -1.442695, %v1167_v59  ;;  %v1503_v59 = vmul.f32 %v1501_v38, %v2375_v43 }
 0x15d   : > { %v1169_v3 = vpop.f32.mrb[15].mxu1  ;;  %v2137_v4 = vpop.eup %2136  ;;  %1420 = vst [vmem:[#allocation2 + $0xc0] sm:$0xf] %v2135_v61  ;;  %2150 = vtanh.f32 %v1122_v51  ;;  %v1984_v17 = vmul.f32 -1.442695, %v1126_v60  ;;  %v1505_v51 = vsub.f32 1.0, %v1501_v38 }
 0x15e   : > { %v2139_v9 = vpop.eup %2138  ;;  %1422 = vst [vmem:[#allocation2 + $0xd0] sm:$0xf] %v2137_v4  ;;  %2152 = vpow2.f32 %v1968_v53  ;;  %v1986_v20 = vmul.f32 -1.442695, %v1169_v3  ;;  %v1525_v49 = vld [vmem:[#allocation2 + $0x40] sm:$0xf0]  ;;  %v1504_v4 = vmul.f32 %v1502_v45, %v2377_v47 }
 0x15f   : > { %v2141_v13 = vpop.eup %2140  ;;  %1421 = vst [vmem:[#allocation2 + $0xc8] sm:$0xf] %v2139_v9  ;;  %2154 = vtanh.f32 %v1165_v54  ;;  %v1509_v54 = vrot.slane %v1499_v44, 4  ;;  %v1523_v56 = vld [vmem:[#allocation2 + $0x40] sm:$0xf]  ;;  %v1510_v60 = vrot.slane %v1500_v48, 4 }
 0x160   : > { %1423 = vst [vmem:[#allocation2 + $0xd8] sm:$0xf] %v2141_v13  ;;  %2156 = vpow2.f32 %v1970_v1  ;;  %v1529_v61 = vsub.f32 1.0, %v1525_v49  ;;  %v1533_v10 = vrot.slane %v1523_v56, 4  ;;  %v1534_v13 = vrot.slane %v1524_v63, 4 }
 0x161   : > { %2158 = vpow2.f32 %v1983_v8  ;;  %v1526_v52 = vld [vmem:[#allocation2 + $0x48] sm:$0xf0]  ;;  %v1513_v9 = vmul.f32 %v1509_v54, %v1505_v51 }
 0x162   : > { %2160 = vpow2.f32 %v1985_v12  ;;  %v1530_v6 = vsub.f32 1.0, %v1526_v52  ;;  %v1514_v12 = vmul.f32 %v1510_v60, %v1506_v55  ;;  %v1537_v16 = vmul.f32 %v1533_v10, %v1529_v61 }
 0x163   : > { %v2143_v26 = vpop.eup %2142  ;;  %2162 = vpow2.f32 %v1984_v17  ;;  %v2381_v15 = vadd.f32 %v1513_v9, %v1503_v59  ;;  %v1550_v24 = vld [vmem:[#allocation2 + $0x58] sm:$0xf0] }
 0x164   : > { %v2145_v29 = vpop.eup %2144  ;;  %1200 = vst [vmem:[#allocation2 + $0x60] sm:$0xf] %v2143_v26  ;;  %2164 = vpow2.f32 %v1986_v20  ;;  %v2383_v17 = vadd.f32 %v1514_v12, %v1504_v4  ;;  %v1538_v0 = vmul.f32 %v1534_v13, %v1530_v6  ;;  %v1549_v20 = vld [vmem:[#allocation2 + $0x50] sm:$0xf0]  ;;  %v1547_v26 = vld [vmem:[#allocation2 + $0x50] sm:$0xf] }
 0x165   : > { %v2147_v32 = vpop.eup %2146  ;;  %1202 = vst [vmem:[#allocation2 + $0x70] sm:$0xf] %v2145_v29  ;;  %v1527_v18 = vmul.f32 %v1525_v49, %v2381_v15  ;;  %v1553_v28 = vsub.f32 1.0, %v1549_v20  ;;  %v1548_v29 = vld [vmem:[#allocation2 + $0x58] sm:$0xf]  ;;  %v1557_v36 = vrot.slane %v1547_v26, 4 }
 0x166   : > { %v2149_v35 = vpop.eup %2148  ;;  %v1312_v40 = vadd.f32 1.0, %v2147_v32  ;;  %v1528_v21 = vmul.f32 %v1526_v52, %v2383_v17  ;;  %v1554_v32 = vsub.f32 1.0, %v1550_v24  ;;  %v1558_v39 = vrot.slane %v1548_v29, 4 }
 0x167   : > { %v2151_v37 = vpop.eup %2150  ;;  %v1314_v41 = vadd.f32 1.0, %v2149_v35  ;;  %v2387_v23 = vadd.f32 %v1537_v16, %v1527_v18 }
 0x168   : > { %v2153_v42 = vpop.eup %2152  ;;  %1201 = vst [vmem:[#allocation2 + $0x68] sm:$0xf] %v2151_v37  ;;  %2166 = vrcp.f32 %v1312_v40  ;;  %v2389_v27 = vadd.f32 %v1538_v0, %v1528_v21  ;;  %v1562_v45 = vmul.f32 %v1558_v39, %v1554_v32  ;;  %v1659_v21 = vld [vmem:[#allocation2 + $0xd0] sm:$0xf]  ;;  %v1678_v39 = vld [vmem:[#allocation2 + $0xc0] sm:$0xf] }
 0x169   : > { %v2155_v46 = vpop.eup %2154  ;;  %v1313_v50 = vadd.f32 1.0, %v2153_v42  ;;  %2168 = vrcp.f32 %v1314_v41  ;;  %v1551_v35 = vmul.f32 %v1549_v20, %v2387_v23  ;;  %v1561_v42 = vmul.f32 %v1557_v36, %v1553_v28 }
 0x16a   : > { %v2157_v2 = vpop.eup %2156  ;;  %1203 = vst [vmem:[#allocation2 + $0x78] sm:$0xf] %v2155_v46  ;;  %v1552_v38 = vmul.f32 %v1550_v24, %v2389_v27 }
 0x16b   : > { %v2159_v53 = vpop.eup %2158  ;;  %2170 = vrcp.f32 %v1313_v50  ;;  %v1315_v57 = vadd.f32 1.0, %v2157_v2  ;;  %v1571_v40 = vld [vmem:[#allocation2 + $0x60] sm:$0xf]  ;;  %v2393_v49 = vadd.f32 %v1561_v42, %v1551_v35 }
 0x16c   : > { %v2161_v58 = vpop.eup %2160  ;;  %v1328_v1 = vadd.f32 1.0, %v2159_v53  ;;  %v1581_v2 = vrot.slane %v1571_v40, 4  ;;  %v2395_v52 = vadd.f32 %v1562_v45, %v1552_v38  ;;  %v1595_v56 = vld [vmem:[#allocation2 + $0x70] sm:$0xf]  ;;  %v1638_v38 = vld [vmem:[#allocation2 + $0x60] sm:$0xf] }
 0x16d   : > { %v2163_v3 = vpop.eup %2162  ;;  %2172 = vrcp.f32 %v1315_v57  ;;  %v1330_v7 = vadd.f32 1.0, %v2161_v58  ;;  %v1605_v6 = vrot.slane %v1595_v56, 4  ;;  %v1619_v16 = vld [vmem:[#allocation2 + $0x70] sm:$0xf] }
 0x16e   : > { %v2165_v8 = vpop.eup %2164  ;;  %2174 = vrcp.f32 %v1328_v1  ;;  %v1329_v11 = vadd.f32 1.0, %v2163_v3  ;;  %v1697_v56 = vld [vmem:[#allocation2 + $0xb0] sm:$0xf] }
 0x16f   : > { %2176 = vrcp.f32 %v1330_v7  ;;  %v1331_v14 = vadd.f32 1.0, %v2165_v8  ;;  %v1572_v48 = vld [vmem:[#allocation2 + $0x68] sm:$0xf] }
 0x170   : > { %2178 = vrcp.f32 %v1329_v11  ;;  %v1582_v58 = vrot.slane %v1572_v48, 4  ;;  %v1679_v48 = vld [vmem:[#allocation2 + $0xc8] sm:$0xf] }
 0x171   : > { %2180 = vrcp.f32 %v1331_v14  ;;  %v1596_v60 = vld [vmem:[#allocation2 + $0x78] sm:$0xf] }
 0x172   : > { %v2167_v19 = vpop.eup %2166  ;;  %v1606_v11 = vrot.slane %v1596_v60, 4  ;;  %v1620_v29 = vld [vmem:[#allocation2 + $0x78] sm:$0xf] }
 0x173   : > { %v2169_v22 = vpop.eup %2168  ;;  %1408 = vst [vmem:[#allocation2 + $0x60] sm:$0xf0] %v2167_v19 }
 0x174   : > { %1410 = vst [vmem:[#allocation2 + $0x70] sm:$0xf0] %v2169_v22 }
 0x175   : > { %v2171_v25 = vpop.eup %2170 }
 0x176   : > { %1409 = vst [vmem:[#allocation2 + $0x68] sm:$0xf0] %v2171_v25 }
 0x177   : > { %v2173_v31 = vpop.eup %2172 }
 0x178   : > { %v2175_v34 = vpop.eup %2174  ;;  %1411 = vst [vmem:[#allocation2 + $0x78] sm:$0xf0] %v2173_v31  ;;  %v1660_v31 = vld [vmem:[#allocation2 + $0xd8] sm:$0xf] }
 0x179   : > { %v2177_v37 = vpop.eup %2176  ;;  %1424 = vst [vmem:[#allocation2 + $0xe0] sm:$0xf] %v2175_v34  ;;  %v1664_v45 = vsub.f32 1.0, %v1660_v31 }
 0x17a   : > { %v2179_v41 = vpop.eup %2178  ;;  %1426 = vst [vmem:[#allocation2 + $0xf0] sm:$0xf] %v2177_v37  ;;  %v1573_v46 = vld [vmem:[#allocation2 + $0x60] sm:$0xf0]  ;;  %v1663_v37 = vsub.f32 1.0, %v1659_v21 }
 0x17b   : > { %v2181_v44 = vpop.eup %2180  ;;  %1425 = vst [vmem:[#allocation2 + $0xe8] sm:$0xf] %v2179_v41  ;;  %v1577_v50 = vsub.f32 1.0, %v1573_v46  ;;  %v1597_v51 = vld [vmem:[#allocation2 + $0x70] sm:$0xf0]  ;;  %v1575_v54 = vmul.f32 %v1573_v46, %v2393_v49 }
 0x17c   : > { %1427 = vst [vmem:[#allocation2 + $0xf8] sm:$0xf] %v2181_v44  ;;  %v1601_v59 = vsub.f32 1.0, %v1597_v51  ;;  %v1639_v46 = vld [vmem:[#allocation2 + $0x68] sm:$0xf] }
 0x17d   : > { %v1574_v53 = vld [vmem:[#allocation2 + $0x68] sm:$0xf0]  ;;  %v1585_v55 = vmul.f32 %v1581_v2, %v1577_v50 }
 0x17e   : > { %v1578_v57 = vsub.f32 1.0, %v1574_v53  ;;  %v1576_v1 = vmul.f32 %v1574_v53, %v2395_v52  ;;  %v1609_v12 = vmul.f32 %v1605_v6, %v1601_v59 }
 0x17f   : > { %v1598_v61 = vld [vmem:[#allocation2 + $0x78] sm:$0xf0]  ;;  %v2398_v63 = vadd.f32 %v1585_v55, %v1575_v54  ;;  %v1657_v54 = vld [vmem:[#allocation2 + $0x50] sm:$0xf]  ;;  %v1682_v55 = vsub.f32 1.0, %v1678_v39 }
 0x180   : > { %v1586_v3 = vmul.f32 %v1582_v58, %v1578_v57  ;;  %v1602_v4 = vsub.f32 1.0, %v1598_v61  ;;  %v1640_v7 = vld [vmem:[#allocation2 + $0xe0] sm:$0xf]  ;;  %v1658_v57 = vld [vmem:[#allocation2 + $0x58] sm:$0xf]  ;;  %v1665_v58 = vmul.f32 %v1663_v37, %v1657_v54 }
 0x181   : > { %v1621_v8 = vld [vmem:[#allocation2 + $0xf0] sm:$0xf]  ;;  %v1599_v9 = vmul.f32 %v1597_v51, %v2398_v63  ;;  %v1644_v19 = vsub.f32 1.0, %v1640_v7 }
 0x182   : > { %v1588_v10 = vadd.f32 %v1586_v3, %v1576_v1  ;;  %v1625_v13 = vsub.f32 1.0, %v1621_v8  ;;  %v1610_v18 = vmul.f32 %v1606_v11, %v1602_v4  ;;  %v1641_v20 = vld [vmem:[#allocation2 + $0xe8] sm:$0xf]  ;;  %v1623_v24 = vmul.f32 0.0, %v1621_v8  ;;  %v1698_v4 = vld [vmem:[#allocation2 + $0xb8] sm:$0xf] }
 0x183   : > { %v1622_v14 = vld [vmem:[#allocation2 + $0xf8] sm:$0xf]  ;;  %v1611_v22 = vadd.f32 %v1609_v12, %v1599_v9  ;;  %v1645_v34 = vsub.f32 1.0, %v1641_v20  ;;  %v1646_v41 = vmul.f32 %v1644_v19, %v1638_v38  ;;  %v1683_v1 = vsub.f32 1.0, %v1679_v48  ;;  %v1676_v12 = vld [vmem:[#allocation2 + $0x40] sm:$0xf] }
 0x184   : > { %v1600_v0 = vmul.f32 %v1598_v61, %v1588_v10  ;;  %v1627_v25 = vmul.f32 %v1625_v13, %v1619_v16  ;;  %v1626_v26 = vsub.f32 1.0, %v1622_v14  ;;  %v1624_v35 = vmul.f32 0.0, %v1622_v14  ;;  %v1716_v13 = vld [vmem:[#allocation2 + $0xa0] sm:$0xf]  ;;  %v1677_v14 = vld [vmem:[#allocation2 + $0x48] sm:$0xf] }
 0x185   : > { %v1647_v2 = vmul.f32 %v1645_v34, %v1639_v46  ;;  %v1666_v3 = vmul.f32 %v1664_v45, %v1658_v57  ;;  %v1591_v6 = vcombine.high %v2398_v63, %v1588_v10  ;;  %v1701_v11 = vsub.f32 1.0, %v1697_v56  ;;  %v1754_v45 = vld [vmem:[#allocation2 + $0x80] sm:$0xf]  ;;  %v1715_v46 = vld [vmem:[#allocation2 + $0x28] sm:$0xf] }
 0x186   : > { %v1612_v28 = vadd.f32 %v1610_v18, %v1600_v0  ;;  %v1629_v32 = vadd.f32 %v1627_v25, %v1623_v24  ;;  %v1628_v36 = vmul.f32 %v1626_v26, %v1620_v29  ;;  %v1684_v16 = vmul.f32 %v1682_v55, %v1676_v12  ;;  %v1695_v26 = vld [vmem:[#allocation2 + $0x30] sm:$0xf]  ;;  %v1755_v55 = vld [vmem:[#allocation2 + $0x88] sm:$0xf] }
 0x187   : > { %v1567_v24 = vcombine.high %v2393_v49, %v2395_v52  ;;  %v1735_v29 = vld [vmem:[#allocation2 + $0x90] sm:$0xf]  ;;  %v1753_v12 = vld [vmem:[#allocation2 + $0x8] sm:$0xf] }
 0x188   : > { %v1615_v40 = vcombine.high %v1611_v22, %v1612_v28  ;;  %v1642_v42 = vmul.f32 %v1640_v7, %v1629_v32  ;;  %v1630_v44 = vadd.f32 %v1628_v36, %v1624_v35  ;;  %v1717_v22 = vld [vmem:[#allocation2 + $0xa8] sm:$0xf]  ;;  %v1720_v28 = vsub.f32 1.0, %v1716_v13 }
 0x189   : > { %v1721_v37 = vsub.f32 1.0, %v1717_v22 }
 0x18a   : > { %v1648_v50 = vadd.f32 %v1646_v41, %v1642_v42  ;;  %v1634_v51 = vcombine.low %v1629_v32, %v1630_v44  ;;  %v1643_v53 = vmul.f32 %v1641_v20, %v1630_v44  ;;  %v1702_v20 = vsub.f32 1.0, %v1698_v4  ;;  %v1714_v44 = vld [vmem:[#allocation2 + $0x20] sm:$0xf] }
 0x18b   : > { %v1703_v32 = vmul.f32 %v1701_v11, %v1695_v26  ;;  %v1739_v42 = vsub.f32 1.0, %v1735_v29  ;;  %v1723_v54 = vmul.f32 %v1721_v37, %v1715_v46  ;;  %v1752_v11 = vld [vmem:[#allocation2] sm:$0xf] }
 0x18c   : > { %v1661_v59 = vmul.f32 %v1659_v21, %v1648_v50  ;;  %v1636_v60 = vadd.f32 %v1634_v51, %v1615_v40  ;;  %v1649_v61 = vadd.f32 %v1647_v2, %v1643_v53  ;;  %v1685_v21 = vmul.f32 %v1683_v1, %v1677_v14 }
 0x18d   : > { %v1543_v40 = vcombine.high %v2387_v23, %v2389_v27 }
 0x18e   : > { %v1667_v7 = vadd.f32 %v1665_v58, %v1661_v59  ;;  %1995 = vst [vmem:[%s2406_s20 + $0x38] sm:$0xff] %v1636_v60  ;;  %v1653_v8 = vcombine.low %v1648_v50, %v1649_v61  ;;  %v1662_v9 = vmul.f32 %v1660_v31, %v1649_v61  ;;  %v1696_v31 = vld [vmem:[#allocation2 + $0x38] sm:$0xf]  ;;  %v1733_v58 = vld [vmem:[#allocation2 + $0x10] sm:$0xf]  ;;  %v1758_v59 = vsub.f32 1.0, %v1754_v45 }
 0x18f   : > { %v1704_v38 = vmul.f32 %v1702_v20, %v1696_v31  ;;  %v1734_v60 = vld [vmem:[#allocation2 + $0x18] sm:$0xf]  ;;  %v1741_v61 = vmul.f32 %v1739_v42, %v1733_v58 }
 0x190   : > { %v1680_v0 = vmul.f32 %v1678_v39, %v1667_v7  ;;  %v1655_v18 = vadd.f32 %v1653_v8, %v1591_v6  ;;  %v1668_v19 = vadd.f32 %v1666_v3, %v1662_v9  ;;  %v1736_v39 = vld [vmem:[#allocation2 + $0x98] sm:$0xf]  ;;  %v1759_v6 = vsub.f32 1.0, %v1755_v55 }
 0x191   : > { %v1740_v53 = vsub.f32 1.0, %v1736_v39  ;;  %v1495_v8 = vcombine.high %v2375_v43, %v2377_v47 }
 0x192   : > { %v1686_v63 = vadd.f32 %v1684_v16, %v1680_v0  ;;  %1997 = vst [vmem:[%s2406_s20 + $0x30] sm:$0xff] %v1655_v18  ;;  %v1672_v10 = vcombine.low %v1667_v7, %v1668_v19  ;;  %v1681_v25 = vmul.f32 %v1679_v48, %v1668_v19  ;;  %v1722_v48 = vmul.f32 %v1720_v28, %v1714_v44 }
 0x193   : > { %v1742_v7 = vmul.f32 %v1740_v53, %v1734_v60  ;;  %v1761_v18 = vmul.f32 %v1759_v6, %v1753_v12  ;;  %v1471_v19 = vcombine.high %v2369_v30, %v2371_v33 }
 0x194   : > { %v1699_v34 = vmul.f32 %v1697_v56, %v1686_v63  ;;  %v1674_v35 = vadd.f32 %v1672_v10, %v1567_v24  ;;  %v1687_v36 = vadd.f32 %v1685_v21, %v1681_v25  ;;  %v1519_v56 = vcombine.high %v2381_v15, %v2383_v17 }
 0x195   : > { %v1448_v24 = vcombine.high %v2363_v62, %v2365_v5 }
 0x196   : > { %v1705_v49 = vadd.f32 %v1703_v32, %v1699_v34  ;;  %1999 = vst [vmem:[%s2406_s20 + $0x28] sm:$0xff] %v1674_v35  ;;  %v1691_v52 = vcombine.low %v1686_v63, %v1687_v36  ;;  %v1700_v41 = vmul.f32 %v1698_v4, %v1687_v36 }
 0x198   : > { %v1718_v50 = vmul.f32 %v1716_v13, %v1705_v49  ;;  %v1693_v2 = vadd.f32 %v1691_v52, %v1543_v40  ;;  %v1706_v51 = vadd.f32 %v1704_v38, %v1700_v41  ;;  %v1760_v13 = vmul.f32 %v1758_v59, %v1752_v11 }
 0x19a   : > { %v1724_v23 = vadd.f32 %v1722_v48, %v1718_v50  ;;  %2001 = vst [vmem:[%s2406_s20 + $0x20] sm:$0xff] %v1693_v2  ;;  %v1710_v27 = vcombine.low %v1705_v49, %v1706_v51  ;;  %v1719_v57 = vmul.f32 %v1717_v22, %v1706_v51 }
 0x19c   : > { %v1737_v1 = vmul.f32 %v1735_v29, %v1724_v23  ;;  %v1712_v3 = vadd.f32 %v1710_v27, %v1519_v56  ;;  %v1725_v4 = vadd.f32 %v1723_v54, %v1719_v57 }
 0x19e   : > { %v1743_v9 = vadd.f32 %v1741_v61, %v1737_v1  ;;  %2003 = vst [vmem:[%s2406_s20 + $0x18] sm:$0xff] %v1712_v3  ;;  %v1729_v15 = vcombine.low %v1724_v23, %v1725_v4  ;;  %v1738_v17 = vmul.f32 %v1736_v39, %v1725_v4 }
 0x1a0   : > { %v1756_v14 = vmul.f32 %v1754_v45, %v1743_v9  ;;  %v1731_v16 = vadd.f32 %v1729_v15, %v1495_v8  ;;  %v1744_v0 = vadd.f32 %v1742_v7, %v1738_v17 }
 0x1a2   : > { %v1762_v20 = vadd.f32 %v1760_v13, %v1756_v14  ;;  %2005 = vst [vmem:[%s2406_s20 + $0x10] sm:$0xff] %v1731_v16  ;;  %v1748_v21 = vcombine.low %v1743_v9, %v1744_v0  ;;  %v1757_v43 = vmul.f32 %v1755_v55, %v1744_v0 }
 0x1a4   : > { %v1750_v47 = vadd.f32 %v1748_v21, %v1471_v19  ;;  %v1763_v22 = vadd.f32 %v1761_v18, %v1757_v43 }
 0x1a6   : > { %2007 = vst [vmem:[%s2406_s20 + $0x8] sm:$0xff] %v1750_v47  ;;  %v1767_v63 = vcombine.low %v1762_v20, %v1763_v22 }
 0x1a8   : > { %v1769_v10 = vadd.f32 %v1767_v63, %v1448_v24 }
 0x1aa   : > { %1770 = vst [vmem:[%s2406_s20] sm:$0xff] %v1769_v10 }
 0x1ab PF: > { %s12_s9 = sadd.s32 1, %s2188_s9  }
 0x1ac   : > { %p9_p4 = scmp.ge.s32.totalorder %s12_s9, 4  }
 0x1ae   :  { %11 = sbr.rel (!%p9_p4) target bundleno = 1 (0x1), region = 65 }

// kernel: _encoder_jit.3
= control target key start
LH: loop header
LB: loop body
LE: loop exit
PB: predicated region body
PF: predicated region fallthrough
CT: control target
= control target key end

     0   :  { %v1023_v3 = vmov 0   ;;  %vm359_vm0 = vcmask 916480   ;;  %s1321_s0 = inlined_call_operand.vmem [shape: bf16[1,112,1024], index: 0, kind: input, shape index: {}]   ;;  %s1322_s1 = inlined_call_operand.vmem [shape: bf16[24,112], index: 1, kind: input, shape index: {}]   ;;  %s1323_s2 = inlined_call_operand.vmem [shape: f32[1,8,8,128], index: 2, kind: output, shape index: {}]  }
   0x1   :  { %v15_v0 = vld [vmem:[%s1321_s0] sm:$0xff]  ;;  %v16_v2 = vld [vmem:[%s1321_s0 + $0x8] sm:$0xff]  ;;  %398 = vmatprep.mubr.bf16.mxu0 %v1023_v3  ;;  %449 = vmatprep.mubr.bf16.mxu1 %v1023_v3  ;;  %v17_v55 = vld [vmem:[%s1321_s0 + $0x10] sm:$0xff] }
   0x2   :  { %v19_v1 = vld [vmem:[%s1321_s0 + $0x20] sm:$0xff]  ;;  %v20_v5 = vld [vmem:[%s1321_s0 + $0x28] sm:$0xff]  ;;  %v21_v56 = vld [vmem:[%s1321_s0 + $0x30] sm:$0xff] }
   0x3   :  { %v840_v4 = vcombine.high %v15_v0, %v19_v1  ;;  %v839_v6 = vcombine.low %v15_v0, %v19_v1  ;;  %v23_v7 = vld [vmem:[%s1321_s0 + $0x40] sm:$0xff]  ;;  %v842_v9 = vcombine.high %v16_v2, %v20_v5  ;;  %v841_v10 = vcombine.low %v16_v2, %v20_v5  ;;  %v24_v12 = vld [vmem:[%s1321_s0 + $0x48] sm:$0xff]  ;;  %v18_v57 = vld [vmem:[%s1321_s0 + $0x18] sm:$0xff] }
   0x4   :  { %v27_v8 = vld [vmem:[%s1321_s0 + $0x60] sm:$0xff]  ;;  %v28_v13 = vld [vmem:[%s1321_s0 + $0x68] sm:$0xff]  ;;  %v22_v58 = vld [vmem:[%s1321_s0 + $0x38] sm:$0xff]  ;;  %v844_v61 = vcombine.high %v17_v55, %v21_v56  ;;  %v843_v5 = vcombine.low %v17_v55, %v21_v56 }
   0x5   :  { %v848_v11 = vcombine.high %v23_v7, %v27_v8  ;;  %v31_v14 = vld [vmem:[%s1321_s0 + $0x80] sm:$0xff]  ;;  %366 = vmatprep.subr.bf16.mxu0 %v840_v4  ;;  %v850_v15 = vcombine.high %v24_v12, %v28_v13  ;;  %v32_v17 = vld [vmem:[%s1321_s0 + $0x88] sm:$0xff]  ;;  %417 = vmatprep.subr.bf16.mxu1 %v842_v9  ;;  %v847_v19 = vcombine.low %v23_v7, %v27_v8  ;;  %v25_v63 = vld [vmem:[%s1321_s0 + $0x50] sm:$0xff] }
   0x6   :  { %v35_v16 = vld [vmem:[%s1321_s0 + $0xa0] sm:$0xff]  ;;  %v36_v18 = vld [vmem:[%s1321_s0 + $0xa8] sm:$0xff]  ;;  %367 = vmatpush1.bf16.msra.mxu0 %v839_v6  ;;  %418 = vmatpush1.bf16.msra.mxu1 %v841_v10  ;;  %v849_v20 = vcombine.low %v24_v12, %v28_v13  ;;  %v846_v62 = vcombine.high %v18_v57, %v22_v58  ;;  %v29_v0 = vld [vmem:[%s1321_s0 + $0x70] sm:$0xff]  ;;  %v845_v6 = vcombine.low %v18_v57, %v22_v58 }
   0x7   :  { %368 = vmatprep.subr.bf16.mxu0 %v848_v11  ;;  %v856_v21 = vcombine.high %v31_v14, %v35_v16  ;;  %419 = vmatprep.subr.bf16.mxu1 %v850_v15  ;;  %v858_v22 = vcombine.high %v32_v17, %v36_v18  ;;  %v39_v23 = vld [vmem:[%s1321_s0 + $0xc0] sm:$0xff]  ;;  %v40_v25 = vld [vmem:[%s1321_s0 + $0xc8] sm:$0xff]  ;;  %v855_v27 = vcombine.low %v31_v14, %v35_v16  ;;  %v26_v2 = vld [vmem:[%s1321_s0 + $0x58] sm:$0xff] }
   0x8   :  { %v43_v24 = vld [vmem:[%s1321_s0 + $0xe0] sm:$0xff]  ;;  %v44_v26 = vld [vmem:[%s1321_s0 + $0xe8] sm:$0xff]  ;;  %v857_v28 = vcombine.low %v32_v17, %v36_v18  ;;  %v30_v4 = vld [vmem:[%s1321_s0 + $0x78] sm:$0xff]  ;;  %v852_v7 = vcombine.high %v25_v63, %v29_v0  ;;  %v851_v13 = vcombine.low %v25_v63, %v29_v0 }
   0x9   :  { %v864_v29 = vcombine.high %v39_v23, %v43_v24  ;;  %v866_v30 = vcombine.high %v40_v25, %v44_v26  ;;  %v47_v31 = vld [vmem:[%s1321_s0 + $0x100] sm:$0xff]  ;;  %v48_v33 = vld [vmem:[%s1321_s0 + $0x108] sm:$0xff]  ;;  %v863_v35 = vcombine.low %v39_v23, %v43_v24  ;;  %v865_v36 = vcombine.low %v40_v25, %v44_v26  ;;  %v33_v9 = vld [vmem:[%s1321_s0 + $0x90] sm:$0xff] }
   0xa   :  { %369 = vmatpush1.bf16.msra.mxu0 %v847_v19  ;;  %420 = vmatpush1.bf16.msra.mxu1 %v849_v20  ;;  %v51_v32 = vld [vmem:[%s1321_s0 + $0x120] sm:$0xff]  ;;  %v52_v34 = vld [vmem:[%s1321_s0 + $0x128] sm:$0xff]  ;;  %v854_v8 = vcombine.high %v26_v2, %v30_v4  ;;  %v37_v10 = vld [vmem:[%s1321_s0 + $0xb0] sm:$0xff]  ;;  %v853_v14 = vcombine.low %v26_v2, %v30_v4 }
   0xb   :  { %370 = vmatprep.subr.bf16.mxu0 %v856_v21  ;;  %421 = vmatprep.subr.bf16.mxu1 %v858_v22  ;;  %v872_v37 = vcombine.high %v47_v31, %v51_v32  ;;  %v874_v38 = vcombine.high %v48_v33, %v52_v34  ;;  %v55_v39 = vld [vmem:[%s1321_s0 + $0x140] sm:$0xff]  ;;  %v56_v41 = vld [vmem:[%s1321_s0 + $0x148] sm:$0xff]  ;;  %v871_v43 = vcombine.low %v47_v31, %v51_v32  ;;  %v34_v11 = vld [vmem:[%s1321_s0 + $0x98] sm:$0xff] }
   0xc   :  { %v59_v40 = vld [vmem:[%s1321_s0 + $0x160] sm:$0xff]  ;;  %v60_v42 = vld [vmem:[%s1321_s0 + $0x168] sm:$0xff]  ;;  %v873_v44 = vcombine.low %v48_v33, %v52_v34  ;;  %v38_v12 = vld [vmem:[%s1321_s0 + $0xb8] sm:$0xff]  ;;  %v860_v15 = vcombine.high %v33_v9, %v37_v10  ;;  %v859_v22 = vcombine.low %v33_v9, %v37_v10 }
   0xd   :  { %v880_v45 = vcombine.high %v55_v39, %v59_v40  ;;  %v882_v46 = vcombine.high %v56_v41, %v60_v42  ;;  %v63_v47 = vld [vmem:[%s1321_s0 + $0x180] sm:$0xff]  ;;  %v64_v49 = vld [vmem:[%s1321_s0 + $0x188] sm:$0xff]  ;;  %v879_v51 = vcombine.low %v55_v39, %v59_v40  ;;  %v881_v52 = vcombine.low %v56_v41, %v60_v42  ;;  %v41_v17 = vld [vmem:[%s1321_s0 + $0xd0] sm:$0xff] }
   0xe   :  { %371 = vmatpush1.bf16.msra.mxu0 %v855_v27  ;;  %422 = vmatpush1.bf16.msra.mxu1 %v857_v28  ;;  %v67_v48 = vld [vmem:[%s1321_s0 + $0x1a0] sm:$0xff]  ;;  %v68_v50 = vld [vmem:[%s1321_s0 + $0x1a8] sm:$0xff]  ;;  %v862_v16 = vcombine.high %v34_v11, %v38_v12  ;;  %v45_v18 = vld [vmem:[%s1321_s0 + $0xf0] sm:$0xff]  ;;  %v861_v23 = vcombine.low %v34_v11, %v38_v12 }
   0xf   :  { %372 = vmatprep.subr.bf16.mxu0 %v864_v29  ;;  %423 = vmatprep.subr.bf16.mxu1 %v866_v30  ;;  %v888_v53 = vcombine.high %v63_v47, %v67_v48  ;;  %v890_v54 = vcombine.high %v64_v49, %v68_v50  ;;  %v887_v59 = vcombine.low %v63_v47, %v67_v48  ;;  %v1146_v1 = vld [vmem:[%s1322_s1] sm:$0xff]   ;;  %v1181_v19 = vld [vmem:[%s1322_s1 + $0x8] ss:$0 sps:$4 sm:$0xff]   ;;  %v42_v20 = vld [vmem:[%s1321_s0 + $0xd8] sm:$0xff] }
  0x10   :  { %v889_v60 = vcombine.low %v64_v49, %v68_v50  ;;  %v46_v21 = vld [vmem:[%s1321_s0 + $0xf8] sm:$0xff]  ;;  %v868_v24 = vcombine.high %v41_v17, %v45_v18  ;;  %v49_v26 = vld [vmem:[%s1321_s0 + $0x110] sm:$0xff]  ;;  %v867_v30 = vcombine.low %v41_v17, %v45_v18 }
  0x11   :  { %v870_v25 = vcombine.high %v42_v20, %v46_v21  ;;  %v53_v27 = vld [vmem:[%s1321_s0 + $0x130] sm:$0xff]  ;;  %v50_v28 = vld [vmem:[%s1321_s0 + $0x118] sm:$0xff]  ;;  %v869_v31 = vcombine.low %v42_v20, %v46_v21 }
  0x12   :  { %373 = vmatpush1.bf16.msra.mxu0 %v863_v35  ;;  %424 = vmatpush1.bf16.msra.mxu1 %v865_v36  ;;  %v54_v29 = vld [vmem:[%s1321_s0 + $0x138] sm:$0xff]  ;;  %v876_v32 = vcombine.high %v49_v26, %v53_v27  ;;  %v57_v34 = vld [vmem:[%s1321_s0 + $0x150] sm:$0xff] }
  0x13   :  { %374 = vmatprep.subr.bf16.mxu0 %v872_v37  ;;  %425 = vmatprep.subr.bf16.mxu1 %v874_v38  ;;  %v878_v33 = vcombine.high %v50_v28, %v54_v29  ;;  %v61_v35 = vld [vmem:[%s1321_s0 + $0x170] sm:$0xff]  ;;  %v58_v36 = vld [vmem:[%s1321_s0 + $0x158] sm:$0xff]  ;;  %v875_v38 = vcombine.low %v49_v26, %v53_v27  ;;  %v877_v39 = vcombine.low %v50_v28, %v54_v29 }
  0x14   :  { %v62_v37 = vld [vmem:[%s1321_s0 + $0x178] sm:$0xff]  ;;  %v884_v40 = vcombine.high %v57_v34, %v61_v35  ;;  %v65_v42 = vld [vmem:[%s1321_s0 + $0x190] sm:$0xff] }
  0x15   :  { %v886_v41 = vcombine.high %v58_v36, %v62_v37  ;;  %v885_v47 = vcombine.low %v58_v36, %v62_v37 }
  0x16   :  { %375 = vmatpush1.bf16.msra.mxu0 %v871_v43  ;;  %426 = vmatpush1.bf16.msra.mxu1 %v873_v44  ;;  %v69_v43 = vld [vmem:[%s1321_s0 + $0x1b0] sm:$0xff]  ;;  %v66_v44 = vld [vmem:[%s1321_s0 + $0x198] sm:$0xff] }
  0x17   :  { %376 = vmatprep.subr.bf16.mxu0 %v880_v45  ;;  %427 = vmatprep.subr.bf16.mxu1 %v882_v46  ;;  %v70_v45 = vld [vmem:[%s1321_s0 + $0x1b8] sm:$0xff]  ;;  %v883_v46 = vcombine.low %v57_v34, %v61_v35  ;;  %v892_v48 = vcombine.high %v65_v42, %v69_v43  ;;  %v891_v50 = vcombine.low %v65_v42, %v69_v43 }
  0x18   :  { %v894_v49 = vcombine.high %v66_v44, %v70_v45 }
  0x1a   :  { %377 = vmatpush1.bf16.msra.mxu0 %v879_v51  ;;  %428 = vmatpush1.bf16.msra.mxu1 %v881_v52  ;;  %v893_v51 = vcombine.low %v66_v44, %v70_v45 }
  0x1b   :  { %378 = vmatprep.subr.bf16.mxu0 %v888_v53  ;;  %429 = vmatprep.subr.bf16.mxu1 %v890_v54 }
  0x1e   :  { %379 = vmatpush1.bf16.msra.mxu0 %v887_v59  ;;  %430 = vmatpush1.bf16.msra.mxu1 %v889_v60 }
  0x1f   :  { %468 = vmatprep.subr.bf16.mxu0 %v844_v61  ;;  %519 = vmatprep.subr.bf16.mxu1 %v846_v62 }
  0x21   :  { %895 = vmatmul.mubr.msk.bf16.vlgmr.msra.gmra.mrb[0].mxu0 %vm359_vm0, %v1146_v1  ;;  %897 = vmatmul.mubr.msk.bf16.vlgmr.msra.gmra.mrb[0].mxu1 %vm359_vm0, %v1146_v1 }
  0x22   :  { %469 = vmatpush1.bf16.msra.mxu0 %v843_v5  ;;  %520 = vmatpush1.bf16.msra.mxu1 %v845_v6 }
  0x23   :  { %470 = vmatprep.subr.bf16.mxu0 %v852_v7  ;;  %521 = vmatprep.subr.bf16.mxu1 %v854_v8 }
  0x24   :  { %408 = vmatprep.mubr.bf16.mxu0 %v1023_v3  ;;  %459 = vmatprep.mubr.bf16.mxu1 %v1023_v3 }
  0x26   :  { %471 = vmatpush1.bf16.msra.mxu0 %v851_v13  ;;  %522 = vmatpush1.bf16.msra.mxu1 %v853_v14 }
  0x27   :  { %472 = vmatprep.subr.bf16.mxu0 %v860_v15  ;;  %523 = vmatprep.subr.bf16.mxu1 %v862_v16 }
  0x29   :  { %896 = vmatmul.mubr.msk.bf16.gmra.mrb[4].mxu0 %vm359_vm0, %v1181_v19  ;;  %898 = vmatmul.mubr.msk.bf16.gmra.mrb[4].mxu1 %vm359_vm0, %v1181_v19 }
  0x2a   :  { %473 = vmatpush1.bf16.msra.mxu0 %v859_v22  ;;  %524 = vmatpush1.bf16.msra.mxu1 %v861_v23 }
  0x2b   :  { %474 = vmatprep.subr.bf16.mxu0 %v868_v24  ;;  %525 = vmatprep.subr.bf16.mxu1 %v870_v25 }
  0x2c   :  { %500 = vmatprep.mubr.bf16.mxu0 %v1023_v3  ;;  %551 = vmatprep.mubr.bf16.mxu1 %v1023_v3 }
  0x2e   :  { %475 = vmatpush1.bf16.msra.mxu0 %v867_v30  ;;  %526 = vmatpush1.bf16.msra.mxu1 %v869_v31 }
  0x2f   :  { %476 = vmatprep.subr.bf16.mxu0 %v876_v32  ;;  %527 = vmatprep.subr.bf16.mxu1 %v878_v33 }
  0x32   :  { %477 = vmatpush1.bf16.msra.mxu0 %v875_v38  ;;  %528 = vmatpush1.bf16.msra.mxu1 %v877_v39 }
  0x33   :  { %478 = vmatprep.subr.bf16.mxu0 %v884_v40  ;;  %529 = vmatprep.subr.bf16.mxu1 %v886_v41 }
  0x36   :  { %479 = vmatpush1.bf16.msra.mxu0 %v883_v46  ;;  %530 = vmatpush1.bf16.msra.mxu1 %v885_v47 }
  0x37   :  { %480 = vmatprep.subr.bf16.mxu0 %v892_v48  ;;  %531 = vmatprep.subr.bf16.mxu1 %v894_v49 }
  0x3a   :  { %481 = vmatpush1.bf16.msra.mxu0 %v891_v50  ;;  %532 = vmatpush1.bf16.msra.mxu1 %v893_v51 }
  0x3d   :  { %899 = vmatmul.mubr.msk.bf16.vlgmr.msra.gmra.mrb[8].mxu0 %vm359_vm0, %v1146_v1  ;;  %901 = vmatmul.mubr.msk.bf16.vlgmr.msra.gmra.mrb[8].mxu1 %vm359_vm0, %v1146_v1 }
  0x3e   :  { %510 = vmatprep.mubr.bf16.mxu0 %v1023_v3  ;;  %561 = vmatprep.mubr.bf16.mxu1 %v1023_v3 }
  0x45   :  { %900 = vmatmul.mubr.msk.bf16.gmra.mrb[12].mxu0 %vm359_vm0, %v1181_v19  ;;  %902 = vmatmul.mubr.msk.bf16.gmra.mrb[12].mxu1 %vm359_vm0, %v1181_v19 }
  0xf4   :  { %v400_v52 = vpop.f32.mrb[0].mxu0  ;;  %v451_v53 = vpop.f32.mrb[0].mxu1 }
  0xf5   :  { %v402_v54 = vpop.f32.mrb[1].mxu0  ;;  %v453_v55 = vpop.f32.mrb[1].mxu1 }
  0xf6   :  { %v404_v56 = vpop.f32.mrb[2].mxu0  ;;  %v455_v58 = vpop.f32.mrb[2].mxu1 }
  0xf7   :  { %v903_v57 = vmul.f32 -1.442695, %v404_v56  ;;  %v406_v59 = vpop.f32.mrb[3].mxu0  ;;  %v905_v60 = vmul.f32 -1.442695, %v455_v58  ;;  %v457_v62 = vpop.f32.mrb[3].mxu1 }
  0xf8   :  { %v904_v61 = vmul.f32 -1.442695, %v406_v59  ;;  %v906_v63 = vmul.f32 -1.442695, %v457_v62 }
  0xf9   :  { %943 = vpow2.f32 %v903_v57 }
  0xfa   :  { %945 = vpow2.f32 %v905_v60 }
  0xfb   :  { %947 = vpow2.f32 %v904_v61 }
  0xfc   :  { %949 = vpow2.f32 %v906_v63  ;;  %v410_v3 = vpop.f32.mrb[4].mxu0  ;;  %v461_v1 = vpop.f32.mrb[4].mxu1 }
  0xfd   :  { %v911_v0 = vmul.f32 -1.442695, %v410_v3  ;;  %v412_v2 = vpop.f32.mrb[5].mxu0  ;;  %v913_v4 = vmul.f32 -1.442695, %v461_v1  ;;  %v463_v6 = vpop.f32.mrb[5].mxu1 }
  0xfe   :  { %v912_v5 = vmul.f32 -1.442695, %v412_v2  ;;  %v414_v7 = vpop.f32.mrb[6].mxu0  ;;  %v914_v8 = vmul.f32 -1.442695, %v463_v6  ;;  %v465_v9 = vpop.f32.mrb[6].mxu1 }
  0xff   :  { %951 = vpow2.f32 %v911_v0  ;;  %v415_v10 = vpop.f32.mrb[7].mxu0  ;;  %v466_v11 = vpop.f32.mrb[7].mxu1 }
 0x100   :  { %953 = vpow2.f32 %v913_v4 }
 0x101   :  { %955 = vpow2.f32 %v912_v5 }
 0x102   :  { %957 = vpow2.f32 %v914_v8 }
 0x103   :  { %v944_v12 = vpop.eup %943  ;;  %959 = vtanh.f32 %v400_v52 }
 0x104   :  { %v946_v13 = vpop.eup %945  ;;  %v634_v14 = vadd.f32 1.0, %v944_v12  ;;  %961 = vtanh.f32 %v451_v53 }
 0x105   :  { %v948_v15 = vpop.eup %947  ;;  %v636_v16 = vadd.f32 1.0, %v946_v13 }
 0x106   :  { %v950_v17 = vpop.eup %949  ;;  %963 = vrcp.f32 %v634_v14  ;;  %v635_v18 = vadd.f32 1.0, %v948_v15 }
 0x107   :  { %965 = vrcp.f32 %v636_v16  ;;  %v637_v19 = vadd.f32 1.0, %v950_v17 }
 0x108   :  { %967 = vrcp.f32 %v635_v18 }
 0x109   :  { %v952_v20 = vpop.eup %951  ;;  %969 = vrcp.f32 %v637_v19 }
 0x10a   :  { %v954_v21 = vpop.eup %953  ;;  %971 = vtanh.f32 %v402_v54  ;;  %v642_v22 = vadd.f32 1.0, %v952_v20 }
 0x10b   :  { %v956_v23 = vpop.eup %955  ;;  %973 = vtanh.f32 %v453_v55  ;;  %v644_v24 = vadd.f32 1.0, %v954_v21 }
 0x10c   :  { %v958_v25 = vpop.eup %957  ;;  %975 = vrcp.f32 %v642_v22  ;;  %v643_v26 = vadd.f32 1.0, %v956_v23 }
 0x10d   :  { %977 = vrcp.f32 %v644_v24  ;;  %v645_v27 = vadd.f32 1.0, %v958_v25  ;;  %v960_v28 = vpop.eup %959 }
 0x10e   :  { %979 = vrcp.f32 %v643_v26  ;;  %v962_v29 = vpop.eup %961 }
 0x10f   :  { %981 = vrcp.f32 %v645_v27 }
 0x110   :  { %v964_v30 = vpop.eup %963  ;;  %v1241_v31 = vpop.f32.mrb[8].mxu0 }
 0x111   :  { %v966_v32 = vpop.eup %965  ;;  %v700_v33 = vmul.f32 0.0, %v964_v30  ;;  %v701_v34 = vsub.f32 1.0, %v964_v30  ;;  %v1243_v35 = vpop.f32.mrb[8].mxu1 }
 0x112   :  { %v1245_v36 = vpop.f32.mrb[9].mxu0  ;;  %v968_v37 = vpop.eup %967  ;;  %v716_v38 = vsub.f32 1.0, %v966_v32 }
 0x113   :  { %v1247_v39 = vpop.f32.mrb[9].mxu1  ;;  %v506_v40 = vpop.f32.mrb[10].mxu0  ;;  %v702_v42 = vmul.f32 %v960_v28, %v701_v34  ;;  %v708_v43 = vsub.f32 1.0, %v968_v37 }
 0x114   :  { %v970_v41 = vpop.eup %969  ;;  %v907_v44 = vmul.f32 -1.442695, %v506_v40  ;;  %v557_v45 = vpop.f32.mrb[10].mxu1  ;;  %v717_v48 = vmul.f32 %v962_v29, %v716_v38 }
 0x115   :  { %v508_v46 = vpop.f32.mrb[11].mxu0  ;;  %v972_v47 = vpop.eup %971  ;;  %v724_v49 = vsub.f32 1.0, %v970_v41  ;;  %v909_v50 = vmul.f32 -1.442695, %v557_v45  ;;  %v1249_v53 = vadd.f32 %v702_v42, %v700_v33 }
 0x116   :  { %v559_v51 = vpop.f32.mrb[11].mxu1  ;;  %v974_v52 = vpop.eup %973  ;;  %v709_v54 = vmul.f32 %v972_v47, %v708_v43  ;;  %983 = vpow2.f32 %v907_v44  ;;  %v908_v55 = vmul.f32 -1.442695, %v508_v46 }
 0x117   :  { %v1251_v56 = vpop.eup %975  ;;  %v725_v57 = vmul.f32 %v974_v52, %v724_v49  ;;  %985 = vpow2.f32 %v909_v50  ;;  %v910_v58 = vmul.f32 -1.442695, %v559_v51  ;;  %v707_v60 = vmul.f32 %v968_v37, %v1249_v53 }
 0x118   :  { %v1253_v59 = vpop.eup %977  ;;  %v827_v61 = vsub.f32 1.0, %v1251_v56  ;;  %987 = vpow2.f32 %v908_v55  ;;  %v512_v3 = vpop.f32.mrb[12].mxu0 }
 0x119   :  { %v1257_v62 = vpop.eup %979  ;;  %v809_v63 = vsub.f32 1.0, %v1253_v59  ;;  %989 = vpow2.f32 %v910_v58  ;;  %v1262_v1 = vadd.f32 %v709_v54, %v707_v60  ;;  %v915_v5 = vmul.f32 -1.442695, %v512_v3  ;;  %v563_v6 = vpop.f32.mrb[12].mxu1 }
 0x11a   :  { %v1260_v0 = vpop.eup %981  ;;  %v1264_v2 = vmul.f32 %v960_v28, %v827_v61  ;;  %v818_v4 = vsub.f32 1.0, %v1257_v62  ;;  %v514_v7 = vpop.f32.mrb[13].mxu0  ;;  %v917_v10 = vmul.f32 -1.442695, %v563_v6 }
 0x11b   :  { %v1267_v8 = vmul.f32 %v962_v29, %v809_v63  ;;  %v800_v9 = vsub.f32 1.0, %v1260_v0  ;;  %v916_v11 = vmul.f32 -1.442695, %v514_v7  ;;  %v565_v12 = vpop.f32.mrb[13].mxu1  ;;  %v715_v13 = vmul.f32 %v966_v32, %v1262_v1  ;;  %v516_v17 = vpop.f32.mrb[14].mxu0 }
 0x11c   :  { %v1271_v14 = vmul.f32 %v972_v47, %v818_v4  ;;  %991 = vpow2.f32 %v915_v5  ;;  %v918_v15 = vmul.f32 -1.442695, %v565_v12  ;;  %v567_v16 = vpop.f32.mrb[14].mxu1  ;;  %v517_v20 = vpop.f32.mrb[15].mxu0 }
 0x11d   :  { %v1273_v18 = vmul.f32 %v974_v52, %v800_v9  ;;  %993 = vpow2.f32 %v917_v10  ;;  %v568_v19 = vpop.f32.mrb[15].mxu1  ;;  %v1275_v21 = vadd.f32 %v717_v48, %v715_v13 }
 0x11e   :  { %995 = vpow2.f32 %v916_v11 }
 0x11f   :  { %997 = vpow2.f32 %v918_v15  ;;  %v723_v23 = vmul.f32 %v970_v41, %v1275_v21 }
 0x120   :  { %v984_v22 = vpop.eup %983  ;;  %999 = vtanh.f32 %v1241_v31 }
 0x121   :  { %v986_v24 = vpop.eup %985  ;;  %v638_v25 = vadd.f32 1.0, %v984_v22  ;;  %1001 = vtanh.f32 %v1243_v35  ;;  %v1280_v27 = vadd.f32 %v725_v57, %v723_v23 }
 0x122   :  { %v988_v26 = vpop.eup %987  ;;  %v640_v28 = vadd.f32 1.0, %v986_v24 }
 0x123   :  { %v990_v29 = vpop.eup %989  ;;  %1003 = vrcp.f32 %v638_v25  ;;  %v639_v30 = vadd.f32 1.0, %v988_v26 }
 0x124   :  { %1005 = vrcp.f32 %v640_v28  ;;  %v641_v32 = vadd.f32 1.0, %v990_v29 }
 0x125   :  { %1007 = vrcp.f32 %v639_v30 }
 0x126   :  { %v992_v33 = vpop.eup %991  ;;  %1009 = vrcp.f32 %v641_v32 }
 0x127   :  { %v994_v34 = vpop.eup %993  ;;  %1011 = vtanh.f32 %v1245_v36  ;;  %v646_v37 = vadd.f32 1.0, %v992_v33 }
 0x128   :  { %v996_v31 = vpop.eup %995  ;;  %1013 = vtanh.f32 %v1247_v39  ;;  %v648_v38 = vadd.f32 1.0, %v994_v34 }
 0x129   :  { %v998_v35 = vpop.eup %997  ;;  %1015 = vrcp.f32 %v646_v37  ;;  %v647_v40 = vadd.f32 1.0, %v996_v31 }
 0x12a   :  { %1017 = vrcp.f32 %v648_v38  ;;  %v649_v41 = vadd.f32 1.0, %v998_v35  ;;  %v1000_v42 = vpop.eup %999 }
 0x12b   :  { %1019 = vrcp.f32 %v647_v40  ;;  %v1002_v43 = vpop.eup %1001 }
 0x12c   :  { %1021 = vrcp.f32 %v649_v41 }
 0x12d   :  { %v1004_v44 = vpop.eup %1003 }
 0x12e   :  { %v1006_v45 = vpop.eup %1005  ;;  %v731_v46 = vmul.f32 %v1004_v44, %v1280_v27  ;;  %v732_v47 = vsub.f32 1.0, %v1004_v44 }
 0x12f   :  { %v1008_v36 = vpop.eup %1007  ;;  %v748_v48 = vsub.f32 1.0, %v1006_v45 }
 0x130   :  { %v1010_v49 = vpop.eup %1009  ;;  %v733_v50 = vmul.f32 %v1000_v42, %v732_v47  ;;  %v740_v39 = vsub.f32 1.0, %v1008_v36 }
 0x131   :  { %v1012_v51 = vpop.eup %1011  ;;  %v749_v52 = vmul.f32 %v1002_v43, %v748_v48  ;;  %v756_v54 = vsub.f32 1.0, %v1010_v49 }
 0x132   :  { %v1014_v55 = vpop.eup %1013  ;;  %v734_v57 = vadd.f32 %v733_v50, %v731_v46  ;;  %v741_v58 = vmul.f32 %v1012_v51, %v740_v39 }
 0x133   :  { %v1016_v60 = vpop.eup %1015  ;;  %v757_v61 = vmul.f32 %v1014_v55, %v756_v54 }
 0x134   :  { %v1018_v63 = vpop.eup %1017  ;;  %v739_v3 = vmul.f32 %v1008_v36, %v734_v57  ;;  %v791_v4 = vsub.f32 1.0, %v1016_v60 }
 0x135   :  { %v1020_v5 = vpop.eup %1019  ;;  %v773_v6 = vsub.f32 1.0, %v1018_v63 }
 0x136   :  { %v1022_v7 = vpop.eup %1021  ;;  %v742_v9 = vadd.f32 %v741_v58, %v739_v3  ;;  %v792_v10 = vmul.f32 %v1000_v42, %v791_v4  ;;  %v782_v11 = vsub.f32 1.0, %v1020_v5 }
 0x137   :  { %v774_v12 = vmul.f32 %v1002_v43, %v773_v6  ;;  %v764_v13 = vsub.f32 1.0, %v1022_v7  ;;  %v763_v17 = vmul.f32 0.0, %v1022_v7 }
 0x138   :  { %v747_v15 = vmul.f32 %v1006_v45, %v742_v9  ;;  %v783_v16 = vmul.f32 %v1012_v51, %v782_v11 }
 0x139   :  { %v765_v19 = vmul.f32 %v1014_v55, %v764_v13 }
 0x13a   :  { %v750_v20 = vadd.f32 %v749_v52, %v747_v15 }
 0x13b   :  { %v766_v22 = vadd.f32 %v765_v19, %v763_v17 }
 0x13c   :  { %v755_v23 = vmul.f32 %v1010_v49, %v750_v20 }
 0x13d   :  { %v772_v24 = vmul.f32 %v1018_v63, %v766_v22 }
 0x13e   :  { %v758_v25 = vadd.f32 %v757_v61, %v755_v23 }
 0x13f   :  { %v775_v26 = vadd.f32 %v774_v12, %v772_v24 }
 0x140   :  { %v768_v28 = vadd.f32 %v766_v22, %v758_v25 }
 0x141   :  { %v777_v29 = vadd.f32 %v775_v26, %v750_v20  ;;  %v781_v30 = vmul.f32 %v1020_v5, %v775_v26 }
 0x142   :  { %927 = vst [vmem:[%s1323_s2 + $0x38] sm:$0xff] %v768_v28 }
 0x143   :  { %929 = vst [vmem:[%s1323_s2 + $0x30] sm:$0xff] %v777_v29  ;;  %v784_v32 = vadd.f32 %v783_v16, %v781_v30 }
 0x145   :  { %v786_v33 = vadd.f32 %v784_v32, %v742_v9  ;;  %v790_v34 = vmul.f32 %v1016_v60, %v784_v32 }
 0x147   :  { %931 = vst [vmem:[%s1323_s2 + $0x28] sm:$0xff] %v786_v33  ;;  %v793_v37 = vadd.f32 %v792_v10, %v790_v34 }
 0x149   :  { %v795_v31 = vadd.f32 %v793_v37, %v734_v57  ;;  %v799_v38 = vmul.f32 %v1260_v0, %v793_v37 }
 0x14b   :  { %933 = vst [vmem:[%s1323_s2 + $0x20] sm:$0xff] %v795_v31  ;;  %v802_v35 = vadd.f32 %v1273_v18, %v799_v38 }
 0x14d   :  { %v804_v40 = vadd.f32 %v802_v35, %v1280_v27  ;;  %v808_v41 = vmul.f32 %v1253_v59, %v802_v35 }
 0x14f   :  { %935 = vst [vmem:[%s1323_s2 + $0x18] sm:$0xff] %v804_v40  ;;  %v811_v42 = vadd.f32 %v1267_v8, %v808_v41 }
 0x151   :  { %v813_v43 = vadd.f32 %v811_v42, %v1275_v21  ;;  %v817_v0 = vmul.f32 %v1257_v62, %v811_v42 }
 0x153   :  { %937 = vst [vmem:[%s1323_s2 + $0x10] sm:$0xff] %v813_v43  ;;  %v820_v18 = vadd.f32 %v1271_v14, %v817_v0 }
 0x155   :  { %v822_v27 = vadd.f32 %v820_v18, %v1262_v1  ;;  %v826_v59 = vmul.f32 %v1251_v56, %v820_v18 }
 0x157   :  { %939 = vst [vmem:[%s1323_s2 + $0x8] sm:$0xff] %v822_v27  ;;  %v829_v8 = vadd.f32 %v1264_v2, %v826_v59 }
 0x159   :  { %v831_v21 = vadd.f32 %v829_v8, %v1249_v53 }
 0x15b   :  { %832 = vst [vmem:[%s1323_s2] sm:$0xff] %v831_v21 }

</bundles_post_ra>
